<compile_context>
chip_gen: v7x
topology: tpu7x:2x2x1
jax: 0.10.0
libtpu: 0.0.40
codegen_flags: <defaults>
</compile_context>

<pallas_src>
from typing import Iterator, List, Optional

import numpy as np
import jax
import jax.numpy as jnp
from jax.experimental import pallas as pl
from jax.experimental.pallas import tpu as pltpu

BOS_TOKEN = '@@BOFSENT@@'
EOS_TOKEN = '@@EOFSENT@@'
PAD_TOKEN = '@@PADDING@@'
UNK_TOKEN = '@@UNKNOWN@@'

PAD_INDEX = 0
UNK_INDEX = 1   # specials=[PAD, UNK, BOS, EOS] -> UNK sits at index 1 (default index)
BOS_INDEX = 2
EOS_INDEX = 3

# Layout / tiling constants.
_LANES = 128
_Q_ROWS = 8                       # query-tile sublanes -> 8*128 = 1024 queries per tile
_Q_TILE = _Q_ROWS * _LANES
_V_TILE_MAX = 2048                # vocab entries per reduction step

# Sentinels that real token hashes are never allowed to take.
_Q_PAD = -2147483648              # padding hash for unused query slots
_V_PAD = -2147483647              # padding hash for unused vocab slots
_BIG = np.int32(np.iinfo(np.int32).max)   # "no match yet" accumulator value


def _fnv1a_32(s: str) -> int:
    """Deterministic 32-bit FNV-1a hash of a token string (host-side glue)."""
    h = 0x811C9DC5
    for b in s.encode("utf-8"):
        h ^= b
        h = (h * 0x01000193) & 0xFFFFFFFF
    if h >= 0x80000000:
        h -= 0x100000000
    if h in (_Q_PAD, _V_PAD):     # keep real hashes away from the pad sentinels
        h += 2
    return h


# ----------------------------------------------------------------------------
# Pallas kernel: streaming min-reduction over vocab tiles.
# ----------------------------------------------------------------------------
def _lookup_kernel(q_ref, v_ref, o_ref, acc_ref):
    """One (query-tile i, vocab-tile k) grid step."""
    k = pl.program_id(1)

    @pl.when(k == 0)
    def _init():
        acc_ref[...] = jnp.full((_Q_ROWS, _LANES), _BIG, dtype=jnp.int32)

    v = v_ref[...]                                    # (Vt, 1) vocab-hash column tile
    vt = v.shape[0]
    # Hoisted once per step (JAX doesn't CSE broadcast_in_dim; inside the row
    # loop this lane-broadcast would be redone 8x).
    vb = jnp.broadcast_to(v, (vt, _LANES))            # (Vt, 128)
    # LOCAL vocab index of every sublane of this tile; the k*Vt global offset
    # is folded in per row at the (1,128) level instead of on the full tile.
    col = jax.lax.broadcasted_iota(jnp.int32, (vt, _LANES), 0)
    off = k * jnp.int32(vt)

    qt = q_ref[...]                                   # (8, 128) resident query tile
    for r in range(_Q_ROWS):
        q_row = qt[r:r + 1, :]                        # (1, 128) query hashes
        eq = vb == q_row                              # (Vt, 128) VPU compare
        # Smallest matching LOCAL index in this tile (tree-min + sublane reduce).
        local = jnp.min(jnp.where(eq, col, _BIG), axis=0, keepdims=True)   # (1, 128)
        cand = jnp.where(local < _BIG, local + off, _BIG)                  # global idx
        acc_ref[pl.ds(r, 1), :] = jnp.minimum(acc_ref[pl.ds(r, 1), :], cand)

    @pl.when(k == pl.num_programs(1) - 1)
    def _finalize():
        a = acc_ref[...]
        # UNK fallback applied once at finalize; lane-dense (8, 128) store.
        o_ref[...] = jnp.where(a < _BIG, a, jnp.int32(UNK_INDEX))


def _vocab_lookup(q_rows: jnp.ndarray, vocab_col: jnp.ndarray) -> jnp.ndarray:
    """q_rows: (Sp/128, 128) int32 query hashes (lane-dense);
       vocab_col: (Vp, 1) int32 vocab hashes  ->  (Sp/128, 128) int32 indices."""
    rp, lanes = q_rows.shape
    vp = vocab_col.shape[0]
    assert lanes == _LANES and rp % _Q_ROWS == 0
    v_tile = min(_V_TILE_MAX, vp)
    assert vp % v_tile == 0
    grid = (rp // _Q_ROWS, vp // v_tile)
    return pl.pallas_call(
        _lookup_kernel,
        out_shape=jax.ShapeDtypeStruct((rp, _LANES), jnp.int32),
        grid=grid,
        in_specs=[
            # Query tile: constant across k -> stays resident (no re-DMA).
            pl.BlockSpec((_Q_ROWS, _LANES), lambda i, k: (i, 0)),
            # Vocab tile: streamed along the trailing reduction axis.
            pl.BlockSpec((v_tile, 1), lambda i, k: (k, 0)),
        ],
        out_specs=pl.BlockSpec((_Q_ROWS, _LANES), lambda i, k: (i, 0)),
        scratch_shapes=[pltpu.VMEM((_Q_ROWS, _LANES), jnp.int32)],
        compiler_params=pltpu.CompilerParams(
            dimension_semantics=("parallel", "arbitrary")),
    )(q_rows, vocab_col)


_vocab_lookup_jit = jax.jit(_vocab_lookup)


# ----------------------------------------------------------------------------
# Vocabulary wrapper mirroring the PyTorch module's interface.
# ----------------------------------------------------------------------------
class Vocabulary:
    def __init__(self, min_freq: int = 1, max_tokens: Optional[int] = None) -> None:
        self._min_freq = min_freq
        self._max_tokens = max_tokens
        self._itos: Optional[List[str]] = None
        self._stoi: Optional[dict] = None
        self._vocab_hashes: Optional[jnp.ndarray] = None   # (Vp, 1) int32
        self._hash_cache: dict = {}

    def _hash(self, tok: str) -> int:
        h = self._hash_cache.get(tok)
        if h is None:
            h = _fnv1a_32(tok)
            self._hash_cache[tok] = h
        return h

    def build(self, iterator: Iterator[List[str]]) -> None:
        # Host-side glue reproducing build_vocab_from_iterator semantics:
        # specials first, remaining tokens by (-freq, token), min_freq/max_tokens.
        freq = {}
        for sent in iterator:
            for tok in sent:
                freq[tok] = freq.get(tok, 0) + 1
        toks = [t for t in freq if freq[t] >= self._min_freq]
        toks.sort(key=lambda t: (-freq[t], t))
        itos = [PAD_TOKEN, UNK_TOKEN, BOS_TOKEN, EOS_TOKEN] + toks
        if self._max_tokens is not None:
            itos = itos[: self._max_tokens]
        self._itos = itos
        self._stoi = {t: i for i, t in enumerate(itos)}

        v = len(itos)
        vp = ((v + _LANES - 1) // _LANES) * _LANES           # pad to multiple of 128 ...
        if vp > _V_TILE_MAX:                                 # ... and of the vocab tile if tiled
            vp = ((vp + _V_TILE_MAX - 1) // _V_TILE_MAX) * _V_TILE_MAX
        hashes = np.full((vp, 1), _V_PAD, dtype=np.int32)
        hashes[:v, 0] = np.fromiter((self._hash(t) for t in itos),
                                    dtype=np.int32, count=v)
        self._vocab_hashes = jnp.asarray(hashes)

    def __len__(self) -> int:
        assert self._itos is not None, "Vocab is not built yet."
        return len(self._itos)

    def __contains__(self, token: str) -> bool:
        assert self._stoi is not None, "Vocab is not built yet."
        return token in self._stoi

    def __getitem__(self, token: str) -> int:
        assert self._stoi is not None, "Vocab is not built yet."
        return self._stoi.get(token, UNK_INDEX)

    def lookup_token(self, index: int) -> str:
        assert self._itos is not None, "Vocab is not built yet."
        return self._itos[index]

    def forward(self, tokens: List[str]) -> List[int]:
        """tokens (list of str) -> list of int indices; unknown -> UNK_INDEX.
        The lookup (compare + min-reduce over the vocab) runs in the Pallas kernel."""
        assert self._vocab_hashes is not None, "Vocab is not built yet."
        s = len(tokens)
        if s == 0:
            return []
        # Bucket the padded length to power-of-two multiples of the query tile
        # so repeated calls hit the jit cache instead of recompiling.
        n_tiles = 1
        while n_tiles * _Q_TILE < s:
            n_tiles *= 2
        sp = n_tiles * _Q_TILE
        q = np.full((sp // _LANES, _LANES), _Q_PAD, dtype=np.int32)
        q.reshape(-1)[:s] = np.fromiter((self._hash(t) for t in tokens),
                                        dtype=np.int32, count=s)
        out = _vocab_lookup_jit(jnp.asarray(q), self._vocab_hashes)
        out = np.asarray(jax.block_until_ready(out)).reshape(-1)[:s]
        return out.tolist()

    __call__ = forward


if __name__ == "__main__":
    # --- Test 1: tiny deterministic corpus, seq = 8 (single grid step) -------
    corpus = [
        ["the", "cat", "sat", "on", "the", "mat"],
        ["the", "dog", "ate", "the", "bone"],
        ["a", "cat", "and", "a", "dog"],
    ]
    vocab = Vocabulary(min_freq=1, max_tokens=None)
    vocab.build(iter(corpus))

    candidates = ["the", "cat", "dog", "mat", "zebra", "quux", BOS_TOKEN, EOS_TOKEN]
    key = jax.random.PRNGKey(0)
    sel = jax.random.randint(key, (8,), 0, len(candidates))
    tokens = [candidates[int(i)] for i in np.asarray(sel)]

    indices = vocab(tokens)
    ref = [vocab[t] for t in tokens]                 # host reference (default_index=UNK)
    assert indices == ref, (indices, ref)

    # --- Test 2: larger vocab + sequence -> exercises the tiled reduction ----
    # (2 query tiles on the parallel axis x 2 vocab tiles on the reduction axis,
    #  i.e. the VMEM accumulator / pl.when init+finalize path.)
    big_corpus = [[f"tok{i}" for i in range(2200)]]
    vocab2 = Vocabulary()
    vocab2.build(iter(big_corpus))

    key2 = jax.random.fold_in(key, 1)
    sel2 = jax.random.randint(key2, (1300,), 0, 2600)   # ids >= 2200 are OOV -> UNK
    tokens2 = [f"tok{int(i)}" for i in np.asarray(sel2)]

    indices2 = vocab2(tokens2)
    ref2 = [vocab2[t] for t in tokens2]
    assert indices2 == ref2

    print("KERNEL_OK")
</pallas_src>

<mosaic_0001>
module attributes {stable_mosaic.version = 11 : i64} {
  func.func @_lookup_kernel(%arg0: i32, %arg1: i32, %arg2: memref<8x128xi32, #tpu.memory_space<vmem>>, %arg3: memref<128x1xi32, #tpu.memory_space<vmem>>, %arg4: memref<8x128xi32, #tpu.memory_space<vmem>>, %arg5: memref<8x128xi32, #tpu.memory_space<vmem>>) attributes {dimension_semantics = [#tpu.dimension_semantics<parallel>, #tpu.dimension_semantics<arbitrary>], iteration_bounds = array<i64: 1, 1>, scalar_prefetch = 0 : i64, scratch_operands = 1 : i64, tpu.core_type = #tpu.core_type<tc>, window_params = [{transform_indices = @transform_0, window_bounds = array<i64: 8, 128>}, {transform_indices = @transform_1, window_bounds = array<i64: 128, 1>}, {transform_indices = @transform_2, window_bounds = array<i64: 8, 128>}]} {
    %c0_i32 = arith.constant 0 : i32
    %0 = arith.cmpi eq, %arg1, %c0_i32 : i32
    %1 = arith.extui %0 : i1 to i32
    %c0_i32_0 = arith.constant 0 : i32
    %2 = arith.cmpi ne, %1, %c0_i32_0 : i32
    scf.if %2 {
      %c2147483647_i32_61 = arith.constant 2147483647 : i32
      %140 = vector.broadcast %c2147483647_i32_61 : i32 to vector<8x128xi32>
      %c0_62 = arith.constant 0 : index
      %c0_63 = arith.constant 0 : index
      %141 = vector.load %arg5[%c0_62, %c0_63] : memref<8x128xi32, #tpu.memory_space<vmem>>, vector<8x128xi32>
      tpu.vector_store %arg5[%c0_62, %c0_63], %140 {strides = array<i32>} : memref<8x128xi32, #tpu.memory_space<vmem>>, vector<8x128xi32>,
    } else {
    }
    %c0 = arith.constant 0 : index
    %c0_1 = arith.constant 0 : index
    %3 = vector.load %arg3[%c0, %c0_1] : memref<128x1xi32, #tpu.memory_space<vmem>>, vector<128x1xi32>
    %4 = vector.shape_cast %3 : vector<128x1xi32> to vector<128x1xi32>
    %5 = vector.broadcast %4 : vector<128x1xi32> to vector<128x128xi32>
    %6 = tpu.iota {dimensions = array<i32: 0>} : vector<128x128xi32>
    %c128_i32 = arith.constant 128 : i32
    %7 = arith.muli %arg1, %c128_i32 : i32
    %c0_2 = arith.constant 0 : index
    %c0_3 = arith.constant 0 : index
    %8 = vector.load %arg2[%c0_2, %c0_3] : memref<8x128xi32, #tpu.memory_space<vmem>>, vector<8x128xi32>
    %9 = vector.extract_strided_slice %8 {offsets = [0, 0], sizes = [1, 128], strides = [1, 1]} : vector<8x128xi32> to vector<1x128xi32>
    %10 = vector.broadcast %9 : vector<1x128xi32> to vector<128x128xi32>
    %11 = arith.cmpi eq, %5, %10 : vector<128x128xi32>
    %c2147483647_i32 = arith.constant 2147483647 : i32
    %12 = vector.broadcast %c2147483647_i32 : i32 to vector<128x128xi32>
    %13 = arith.select %11, %6, %12 : vector<128x128xi1>, vector<128x128xi32>
    %cst = arith.constant dense<2147483647> : vector<128xi32>
    %14 = vector.multi_reduction <minsi>, %13, %cst [0] : vector<128x128xi32> to vector<128xi32>
    %15 = vector.shape_cast %14 : vector<128xi32> to vector<1x128xi32>
    %c2147483647_i32_4 = arith.constant 2147483647 : i32
    %16 = vector.broadcast %c2147483647_i32_4 : i32 to vector<1x128xi32>
    %17 = arith.cmpi slt, %15, %16 : vector<1x128xi32>
    %18 = vector.broadcast %7 : i32 to vector<1x128xi32>
    %19 = arith.addi %15, %18 : vector<1x128xi32>
    %c2147483647_i32_5 = arith.constant 2147483647 : i32
    %20 = vector.broadcast %c2147483647_i32_5 : i32 to vector<1x128xi32>
    %21 = arith.select %17, %19, %20 : vector<1x128xi1>, vector<1x128xi32>
    %c0_6 = arith.constant 0 : index
    %c0_7 = arith.constant 0 : index
    %22 = vector.load %arg5[%c0_6, %c0_7] : memref<8x128xi32, #tpu.memory_space<vmem>>, vector<1x128xi32>
    %23 = arith.minsi %22, %21 : vector<1x128xi32>
    %c0_8 = arith.constant 0 : index
    %c0_9 = arith.constant 0 : index
    %24 = vector.load %arg5[%c0_8, %c0_9] : memref<8x128xi32, #tpu.memory_space<vmem>>, vector<1x128xi32>
    tpu.vector_store %arg5[%c0_8, %c0_9], %23 {strides = array<i32>} : memref<8x128xi32, #tpu.memory_space<vmem>>, vector<1x128xi32>,
    %25 = vector.extract_strided_slice %8 {offsets = [1, 0], sizes = [1, 128], strides = [1, 1]} : vector<8x128xi32> to vector<1x128xi32>
    %26 = vector.broadcast %25 : vector<1x128xi32> to vector<128x128xi32>
    %27 = arith.cmpi eq, %5, %26 : vector<128x128xi32>
    %c2147483647_i32_10 = arith.constant 2147483647 : i32
    %28 = vector.broadcast %c2147483647_i32_10 : i32 to vector<128x128xi32>
    %29 = arith.select %27, %6, %28 : vector<128x128xi1>, vector<128x128xi32>
    %cst_11 = arith.constant dense<2147483647> : vector<128xi32>
    %30 = vector.multi_reduction <minsi>, %29, %cst_11 [0] : vector<128x128xi32> to vector<128xi32>
    %31 = vector.shape_cast %30 : vector<128xi32> to vector<1x128xi32>
    %c2147483647_i32_12 = arith.constant 2147483647 : i32
    %32 = vector.broadcast %c2147483647_i32_12 : i32 to vector<1x128xi32>
    %33 = arith.cmpi slt, %31, %32 : vector<1x128xi32>
    %34 = vector.broadcast %7 : i32 to vector<1x128xi32>
    %35 = arith.addi %31, %34 : vector<1x128xi32>
    %c2147483647_i32_13 = arith.constant 2147483647 : i32
    %36 = vector.broadcast %c2147483647_i32_13 : i32 to vector<1x128xi32>
    %37 = arith.select %33, %35, %36 : vector<1x128xi1>, vector<1x128xi32>
    %c1 = arith.constant 1 : index
    %c0_14 = arith.constant 0 : index
    %38 = vector.load %arg5[%c1, %c0_14] : memref<8x128xi32, #tpu.memory_space<vmem>>, vector<1x128xi32>
    %39 = arith.minsi %38, %37 : vector<1x128xi32>
    %c1_15 = arith.constant 1 : index
    %c0_16 = arith.constant 0 : index
    %40 = vector.load %arg5[%c1_15, %c0_16] : memref<8x128xi32, #tpu.memory_space<vmem>>, vector<1x128xi32>
    tpu.vector_store %arg5[%c1_15, %c0_16], %39 {strides = array<i32>} : memref<8x128xi32, #tpu.memory_space<vmem>>, vector<1x128xi32>,
    %41 = vector.extract_strided_slice %8 {offsets = [2, 0], sizes = [1, 128], strides = [1, 1]} : vector<8x128xi32> to vector<1x128xi32>
    %42 = vector.broadcast %41 : vector<1x128xi32> to vector<128x128xi32>
    %43 = arith.cmpi eq, %5, %42 : vector<128x128xi32>
    %c2147483647_i32_17 = arith.constant 2147483647 : i32
    %44 = vector.broadcast %c2147483647_i32_17 : i32 to vector<128x128xi32>
    %45 = arith.select %43, %6, %44 : vector<128x128xi1>, vector<128x128xi32>
    %cst_18 = arith.constant dense<2147483647> : vector<128xi32>
    %46 = vector.multi_reduction <minsi>, %45, %cst_18 [0] : vector<128x128xi32> to vector<128xi32>
    %47 = vector.shape_cast %46 : vector<128xi32> to vector<1x128xi32>
    %c2147483647_i32_19 = arith.constant 2147483647 : i32
    %48 = vector.broadcast %c2147483647_i32_19 : i32 to vector<1x128xi32>
    %49 = arith.cmpi slt, %47, %48 : vector<1x128xi32>
    %50 = vector.broadcast %7 : i32 to vector<1x128xi32>
    %51 = arith.addi %47, %50 : vector<1x128xi32>
    %c2147483647_i32_20 = arith.constant 2147483647 : i32
    %52 = vector.broadcast %c2147483647_i32_20 : i32 to vector<1x128xi32>
    %53 = arith.select %49, %51, %52 : vector<1x128xi1>, vector<1x128xi32>
    %c2 = arith.constant 2 : index
    %c0_21 = arith.constant 0 : index
    %54 = vector.load %arg5[%c2, %c0_21] : memref<8x128xi32, #tpu.memory_space<vmem>>, vector<1x128xi32>
    %55 = arith.minsi %54, %53 : vector<1x128xi32>
    %c2_22 = arith.constant 2 : index
    %c0_23 = arith.constant 0 : index
    %56 = vector.load %arg5[%c2_22, %c0_23] : memref<8x128xi32, #tpu.memory_space<vmem>>, vector<1x128xi32>
    tpu.vector_store %arg5[%c2_22, %c0_23], %55 {strides = array<i32>} : memref<8x128xi32, #tpu.memory_space<vmem>>, vector<1x128xi32>,
    %57 = vector.extract_strided_slice %8 {offsets = [3, 0], sizes = [1, 128], strides = [1, 1]} : vector<8x128xi32> to vector<1x128xi32>
    %58 = vector.broadcast %57 : vector<1x128xi32> to vector<128x128xi32>
    %59 = arith.cmpi eq, %5, %58 : vector<128x128xi32>
    %c2147483647_i32_24 = arith.constant 2147483647 : i32
    %60 = vector.broadcast %c2147483647_i32_24 : i32 to vector<128x128xi32>
    %61 = arith.select %59, %6, %60 : vector<128x128xi1>, vector<128x128xi32>
    %cst_25 = arith.constant dense<2147483647> : vector<128xi32>
    %62 = vector.multi_reduction <minsi>, %61, %cst_25 [0] : vector<128x128xi32> to vector<128xi32>
    %63 = vector.shape_cast %62 : vector<128xi32> to vector<1x128xi32>
    %c2147483647_i32_26 = arith.constant 2147483647 : i32
    %64 = vector.broadcast %c2147483647_i32_26 : i32 to vector<1x128xi32>
    %65 = arith.cmpi slt, %63, %64 : vector<1x128xi32>
    %66 = vector.broadcast %7 : i32 to vector<1x128xi32>
    %67 = arith.addi %63, %66 : vector<1x128xi32>
    %c2147483647_i32_27 = arith.constant 2147483647 : i32
    %68 = vector.broadcast %c2147483647_i32_27 : i32 to vector<1x128xi32>
    %69 = arith.select %65, %67, %68 : vector<1x128xi1>, vector<1x128xi32>
    %c3 = arith.constant 3 : index
    %c0_28 = arith.constant 0 : index
    %70 = vector.load %arg5[%c3, %c0_28] : memref<8x128xi32, #tpu.memory_space<vmem>>, vector<1x128xi32>
    %71 = arith.minsi %70, %69 : vector<1x128xi32>
    %c3_29 = arith.constant 3 : index
    %c0_30 = arith.constant 0 : index
    %72 = vector.load %arg5[%c3_29, %c0_30] : memref<8x128xi32, #tpu.memory_space<vmem>>, vector<1x128xi32>
    tpu.vector_store %arg5[%c3_29, %c0_30], %71 {strides = array<i32>} : memref<8x128xi32, #tpu.memory_space<vmem>>, vector<1x128xi32>,
    %73 = vector.extract_strided_slice %8 {offsets = [4, 0], sizes = [1, 128], strides = [1, 1]} : vector<8x128xi32> to vector<1x128xi32>
    %74 = vector.broadcast %73 : vector<1x128xi32> to vector<128x128xi32>
    %75 = arith.cmpi eq, %5, %74 : vector<128x128xi32>
    %c2147483647_i32_31 = arith.constant 2147483647 : i32
    %76 = vector.broadcast %c2147483647_i32_31 : i32 to vector<128x128xi32>
    %77 = arith.select %75, %6, %76 : vector<128x128xi1>, vector<128x128xi32>
    %cst_32 = arith.constant dense<2147483647> : vector<128xi32>
    %78 = vector.multi_reduction <minsi>, %77, %cst_32 [0] : vector<128x128xi32> to vector<128xi32>
    %79 = vector.shape_cast %78 : vector<128xi32> to vector<1x128xi32>
    %c2147483647_i32_33 = arith.constant 2147483647 : i32
    %80 = vector.broadcast %c2147483647_i32_33 : i32 to vector<1x128xi32>
    %81 = arith.cmpi slt, %79, %80 : vector<1x128xi32>
    %82 = vector.broadcast %7 : i32 to vector<1x128xi32>
    %83 = arith.addi %79, %82 : vector<1x128xi32>
    %c2147483647_i32_34 = arith.constant 2147483647 : i32
    %84 = vector.broadcast %c2147483647_i32_34 : i32 to vector<1x128xi32>
    %85 = arith.select %81, %83, %84 : vector<1x128xi1>, vector<1x128xi32>
    %c4 = arith.constant 4 : index
    %c0_35 = arith.constant 0 : index
    %86 = vector.load %arg5[%c4, %c0_35] : memref<8x128xi32, #tpu.memory_space<vmem>>, vector<1x128xi32>
    %87 = arith.minsi %86, %85 : vector<1x128xi32>
    %c4_36 = arith.constant 4 : index
    %c0_37 = arith.constant 0 : index
    %88 = vector.load %arg5[%c4_36, %c0_37] : memref<8x128xi32, #tpu.memory_space<vmem>>, vector<1x128xi32>
    tpu.vector_store %arg5[%c4_36, %c0_37], %87 {strides = array<i32>} : memref<8x128xi32, #tpu.memory_space<vmem>>, vector<1x128xi32>,
    %89 = vector.extract_strided_slice %8 {offsets = [5, 0], sizes = [1, 128], strides = [1, 1]} : vector<8x128xi32> to vector<1x128xi32>
    %90 = vector.broadcast %89 : vector<1x128xi32> to vector<128x128xi32>
    %91 = arith.cmpi eq, %5, %90 : vector<128x128xi32>
    %c2147483647_i32_38 = arith.constant 2147483647 : i32
    %92 = vector.broadcast %c2147483647_i32_38 : i32 to vector<128x128xi32>
    %93 = arith.select %91, %6, %92 : vector<128x128xi1>, vector<128x128xi32>
    %cst_39 = arith.constant dense<2147483647> : vector<128xi32>
    %94 = vector.multi_reduction <minsi>, %93, %cst_39 [0] : vector<128x128xi32> to vector<128xi32>
    %95 = vector.shape_cast %94 : vector<128xi32> to vector<1x128xi32>
    %c2147483647_i32_40 = arith.constant 2147483647 : i32
    %96 = vector.broadcast %c2147483647_i32_40 : i32 to vector<1x128xi32>
    %97 = arith.cmpi slt, %95, %96 : vector<1x128xi32>
    %98 = vector.broadcast %7 : i32 to vector<1x128xi32>
    %99 = arith.addi %95, %98 : vector<1x128xi32>
    %c2147483647_i32_41 = arith.constant 2147483647 : i32
    %100 = vector.broadcast %c2147483647_i32_41 : i32 to vector<1x128xi32>
    %101 = arith.select %97, %99, %100 : vector<1x128xi1>, vector<1x128xi32>
    %c5 = arith.constant 5 : index
    %c0_42 = arith.constant 0 : index
    %102 = vector.load %arg5[%c5, %c0_42] : memref<8x128xi32, #tpu.memory_space<vmem>>, vector<1x128xi32>
    %103 = arith.minsi %102, %101 : vector<1x128xi32>
    %c5_43 = arith.constant 5 : index
    %c0_44 = arith.constant 0 : index
    %104 = vector.load %arg5[%c5_43, %c0_44] : memref<8x128xi32, #tpu.memory_space<vmem>>, vector<1x128xi32>
    tpu.vector_store %arg5[%c5_43, %c0_44], %103 {strides = array<i32>} : memref<8x128xi32, #tpu.memory_space<vmem>>, vector<1x128xi32>,
    %105 = vector.extract_strided_slice %8 {offsets = [6, 0], sizes = [1, 128], strides = [1, 1]} : vector<8x128xi32> to vector<1x128xi32>
    %106 = vector.broadcast %105 : vector<1x128xi32> to vector<128x128xi32>
    %107 = arith.cmpi eq, %5, %106 : vector<128x128xi32>
    %c2147483647_i32_45 = arith.constant 2147483647 : i32
    %108 = vector.broadcast %c2147483647_i32_45 : i32 to vector<128x128xi32>
    %109 = arith.select %107, %6, %108 : vector<128x128xi1>, vector<128x128xi32>
    %cst_46 = arith.constant dense<2147483647> : vector<128xi32>
    %110 = vector.multi_reduction <minsi>, %109, %cst_46 [0] : vector<128x128xi32> to vector<128xi32>
    %111 = vector.shape_cast %110 : vector<128xi32> to vector<1x128xi32>
    %c2147483647_i32_47 = arith.constant 2147483647 : i32
    %112 = vector.broadcast %c2147483647_i32_47 : i32 to vector<1x128xi32>
    %113 = arith.cmpi slt, %111, %112 : vector<1x128xi32>
    %114 = vector.broadcast %7 : i32 to vector<1x128xi32>
    %115 = arith.addi %111, %114 : vector<1x128xi32>
    %c2147483647_i32_48 = arith.constant 2147483647 : i32
    %116 = vector.broadcast %c2147483647_i32_48 : i32 to vector<1x128xi32>
    %117 = arith.select %113, %115, %116 : vector<1x128xi1>, vector<1x128xi32>
    %c6 = arith.constant 6 : index
    %c0_49 = arith.constant 0 : index
    %118 = vector.load %arg5[%c6, %c0_49] : memref<8x128xi32, #tpu.memory_space<vmem>>, vector<1x128xi32>
    %119 = arith.minsi %118, %117 : vector<1x128xi32>
    %c6_50 = arith.constant 6 : index
    %c0_51 = arith.constant 0 : index
    %120 = vector.load %arg5[%c6_50, %c0_51] : memref<8x128xi32, #tpu.memory_space<vmem>>, vector<1x128xi32>
    tpu.vector_store %arg5[%c6_50, %c0_51], %119 {strides = array<i32>} : memref<8x128xi32, #tpu.memory_space<vmem>>, vector<1x128xi32>,
    %121 = vector.extract_strided_slice %8 {offsets = [7, 0], sizes = [1, 128], strides = [1, 1]} : vector<8x128xi32> to vector<1x128xi32>
    %122 = vector.broadcast %121 : vector<1x128xi32> to vector<128x128xi32>
    %123 = arith.cmpi eq, %5, %122 : vector<128x128xi32>
    %c2147483647_i32_52 = arith.constant 2147483647 : i32
    %124 = vector.broadcast %c2147483647_i32_52 : i32 to vector<128x128xi32>
    %125 = arith.select %123, %6, %124 : vector<128x128xi1>, vector<128x128xi32>
    %cst_53 = arith.constant dense<2147483647> : vector<128xi32>
    %126 = vector.multi_reduction <minsi>, %125, %cst_53 [0] : vector<128x128xi32> to vector<128xi32>
    %127 = vector.shape_cast %126 : vector<128xi32> to vector<1x128xi32>
    %c2147483647_i32_54 = arith.constant 2147483647 : i32
    %128 = vector.broadcast %c2147483647_i32_54 : i32 to vector<1x128xi32>
    %129 = arith.cmpi slt, %127, %128 : vector<1x128xi32>
    %130 = vector.broadcast %7 : i32 to vector<1x128xi32>
    %131 = arith.addi %127, %130 : vector<1x128xi32>
    %c2147483647_i32_55 = arith.constant 2147483647 : i32
    %132 = vector.broadcast %c2147483647_i32_55 : i32 to vector<1x128xi32>
    %133 = arith.select %129, %131, %132 : vector<1x128xi1>, vector<1x128xi32>
    %c7 = arith.constant 7 : index
    %c0_56 = arith.constant 0 : index
    %134 = vector.load %arg5[%c7, %c0_56] : memref<8x128xi32, #tpu.memory_space<vmem>>, vector<1x128xi32>
    %135 = arith.minsi %134, %133 : vector<1x128xi32>
    %c7_57 = arith.constant 7 : index
    %c0_58 = arith.constant 0 : index
    %136 = vector.load %arg5[%c7_57, %c0_58] : memref<8x128xi32, #tpu.memory_space<vmem>>, vector<1x128xi32>
    tpu.vector_store %arg5[%c7_57, %c0_58], %135 {strides = array<i32>} : memref<8x128xi32, #tpu.memory_space<vmem>>, vector<1x128xi32>,
    %c0_i32_59 = arith.constant 0 : i32
    %137 = arith.cmpi eq, %arg1, %c0_i32_59 : i32
    %138 = arith.extui %137 : i1 to i32
    %c0_i32_60 = arith.constant 0 : i32
    %139 = arith.cmpi ne, %138, %c0_i32_60 : i32
    scf.if %139 {
      %c0_61 = arith.constant 0 : index
      %c0_62 = arith.constant 0 : index
      %140 = vector.load %arg5[%c0_61, %c0_62] : memref<8x128xi32, #tpu.memory_space<vmem>>, vector<8x128xi32>
      %c2147483647_i32_63 = arith.constant 2147483647 : i32
      %141 = vector.broadcast %c2147483647_i32_63 : i32 to vector<8x128xi32>
      %142 = arith.cmpi slt, %140, %141 : vector<8x128xi32>
      %c1_i32 = arith.constant 1 : i32
      %143 = vector.broadcast %c1_i32 : i32 to vector<8x128xi32>
      %144 = arith.select %142, %140, %143 : vector<8x128xi1>, vector<8x128xi32>
      %c0_64 = arith.constant 0 : index
      %c0_65 = arith.constant 0 : index
      %145 = vector.load %arg4[%c0_64, %c0_65] : memref<8x128xi32, #tpu.memory_space<vmem>>, vector<8x128xi32>
      tpu.vector_store %arg4[%c0_64, %c0_65], %144 {strides = array<i32>} : memref<8x128xi32, #tpu.memory_space<vmem>>, vector<8x128xi32>,
    } else {
    }
    return
  }
  func.func @transform_0(%arg0: i32, %arg1: i32) -> (i32, i32) {
    %c0_i32 = arith.constant 0 : i32
    %c0_i32_0 = arith.constant 0 : i32
    return %arg0, %c0_i32 : i32, i32
  }
  func.func @transform_1(%arg0: i32, %arg1: i32) -> (i32, i32) {
    %c0_i32 = arith.constant 0 : i32
    %c0_i32_0 = arith.constant 0 : i32
    return %arg1, %c0_i32 : i32, i32
  }
  func.func @transform_2(%arg0: i32, %arg1: i32) -> (i32, i32) {
    %c0_i32 = arith.constant 0 : i32
    %c0_i32_0 = arith.constant 0 : i32
    return %arg0, %c0_i32 : i32, i32
  }
}

</mosaic_0001>

<bundles_post_ra>
// kernel: _vocab_lookup.1
= control target key start
LH: loop header
LB: loop body
LE: loop exit
PB: predicated region body
PF: predicated region fallthrough
CT: control target
= control target key end

     0   :  { %v807_v2 = vmov 0   ;;  %s2021_s0 = inlined_call_operand.vmem [shape: s32[8,128], index: 0, kind: input, shape index: {}]   ;;  %s2022_s1 = inlined_call_operand.vmem [shape: s32[128,1], index: 1, kind: input, shape index: {}]   ;;  %s2023_s2 = inlined_call_operand.hbm [shape: s32[8,128], index: 2, kind: output, shape index: {}]  }
   0x1   :  { %v19_v0 = vld [vmem:[%s2022_s1 + $0x10] sm:$0xff]  ;;  %v17_v1 = vld [vmem:[%s2022_s1] sm:$0xff]  ;;  %782 = vset.pattern.permute.xlu1 %v807_v2  ;;  %781 = vset.pattern.permute.xlu0 %v807_v2  ;;  %v20_v3 = vld [vmem:[%s2022_s1 + $0x18] sm:$0xff] }
   0x2   :  { %40 = vperm.xlu1 %782, %v19_v0   ;;  %34 = vperm.xlu0 %781, %v17_v1   ;;  %v18_v4 = vld [vmem:[%s2022_s1 + $0x8] sm:$0xff] }
   0x6   :  { %43 = vperm.xlu1 %782, %v20_v3   ;;  %37 = vperm.xlu0 %781, %v18_v4  }
   0x7   :  { %7 = vsyncpa [#allocation4], 0  ;;  %v22_v5 = vld [vmem:[%s2022_s1 + $0x28] sm:$0xff]  ;;  %v21_v6 = vld [vmem:[%s2022_s1 + $0x20] sm:$0xff]  ;;  %v808_v17 = vmov 2147483647   ;;  %v81_v18 = vlaneseq }
   0x8   :  { %v24_v7 = vld [vmem:[%s2022_s1 + $0x38] sm:$0xff]  ;;  %v23_v8 = vld [vmem:[%s2022_s1 + $0x30] sm:$0xff]  ;;  %v26_v9 = vld [vmem:[%s2022_s1 + $0x48] sm:$0xff]  ;;  %16 = vst [vmem:[#allocation2] sm:$0xff] %v808_v17 }
   0x9   :  { %v25_v10 = vld [vmem:[%s2022_s1 + $0x40] sm:$0xff]  ;;  %v28_v11 = vld [vmem:[%s2022_s1 + $0x58] sm:$0xff]  ;;  %v27_v12 = vld [vmem:[%s2022_s1 + $0x50] sm:$0xff]  ;;  %v873_v19 = vshrl.u32 %v81_v18, 7 }
   0xa   :  { %49 = vperm.xlu1 %782, %v22_v5   ;;  %46 = vperm.xlu0 %781, %v21_v6   ;;  %v30_v13 = vld [vmem:[%s2022_s1 + $0x68] sm:$0xff]  ;;  %v29_v14 = vld [vmem:[%s2022_s1 + $0x60] sm:$0xff]  ;;  %v32_v15 = vld [vmem:[%s2022_s1 + $0x78] sm:$0xff] }
   0xb   :  { %v31_v16 = vld [vmem:[%s2022_s1 + $0x70] sm:$0xff]  ;;  %v102_v20 = vsub.s32 0, %v873_v19  ;;  %v185_v21 = vsub.s32 1, %v873_v19  ;;  %v267_v22 = vsub.s32 2, %v873_v19  ;;  %v349_v23 = vsub.s32 3, %v873_v19  ;;  %v99_v24 = vld [vmem:[%s2021_s0] sm:$0xff] }
   0xc   :  { %v431_v25 = vsub.s32 4, %v873_v19  ;;  %v513_v26 = vsub.s32 5, %v873_v19  ;;  %v595_v27 = vsub.s32 6, %v873_v19  ;;  %v677_v28 = vsub.s32 7, %v873_v19  ;;  %s809_s0 = smov [#allocation3]  }
   0xd   :  { %v84_v29 = vadd.s32 16, %v873_v19  ;;  %v887_v30 = vrot.slane %v99_v24, %v102_v20  ;;  %v889_v31 = vrot.slane %v99_v24, %v185_v21  ;;  %v891_v32 = vrot.slane %v99_v24, %v267_v22  ;;  %s770_s1 = sshll.u32 %s809_s0, 4  ;;  %s771_s1 = int_to_ptr.vmem [resolvable:$true] %s770_s1 }
   0xe   :  { %55 = vperm.xlu1 %782, %v24_v7   ;;  %52 = vperm.xlu0 %781, %v23_v8   ;;  %v893_v33 = vrot.slane %v99_v24, %v349_v23  ;;  %v895_v34 = vrot.slane %v99_v24, %v431_v25  ;;  %v897_v35 = vrot.slane %v99_v24, %v513_v26  ;;  %v904_v39 = vadd.s32 24, %v873_v19  ;;  %s783_s15 = scalar_lea.vmem %s771_s1, 128  ;;  %p788_p1 = scmp.lt.s32.totalorder %s771_s1, %s771_s1 }
   0xf   :  { %v899_v36 = vrot.slane %v99_v24, %v595_v27  ;;  %v901_v37 = vrot.slane %v99_v24, %v677_v28  ;;  %v907_v40 = vadd.s32 8, %v873_v19  ;;  %v910_v41 = vadd.s32 40, %v873_v19  ;;  %p784_p0 = scmp.ne.s32.totalorder %s771_s1, %s783_s15  ;;  %p789_p2 = scmp.lt.s32.totalorder %s783_s15, %s783_s15 }
  0x10   :  { %v913_v42 = vadd.s32 32, %v873_v19  ;;  %v916_v43 = vadd.s32 56, %v873_v19  ;;  %v919_v44 = vadd.s32 48, %v873_v19  ;;  %v922_v45 = vadd.s32 72, %v873_v19 }
  0x11   :  { %v925_v46 = vadd.s32 64, %v873_v19  ;;  %v930_v47 = vadd.s32 104, %v873_v19  ;;  %v933_v48 = vadd.s32 96, %v873_v19  ;;  %v938_v50 = vadd.s32 88, %v873_v19  ;;  %p790_p3 = por %p789_p2, %p788_p1 }
  0x12   :  { %61 = vperm.xlu1 %782, %v26_v9   ;;  %58 = vperm.xlu0 %781, %v25_v10   ;;  %v941_v51 = vadd.s32 120, %v873_v19  ;;  %v947_v52 = vadd.s32 80, %v873_v19  ;;  %v955_v55 = vadd.s32 112, %v873_v19 }
  0x13   :  { %2050 = vst [vmem:[#allocation6_spill] sm:$0xff] %v938_v50  ;;  %p791_p4 = pnand %p790_p3, %p784_p0 }
  0x14   :  { %2051 = vst [vmem:[#allocation7_spill] sm:$0xff] %v941_v51  ;;  %2052 = vst [vmem:[#allocation8_spill] sm:$0xff] %v947_v52 }
  0x15   :  { %2055 = vst [vmem:[#allocation11_spill] sm:$0xff] %v955_v55 }
  0x16   :  { %67 = vperm.xlu1 %782, %v28_v11   ;;  %64 = vperm.xlu0 %781, %v27_v12  }
  0x1a   :  { %73 = vperm.xlu1 %782, %v30_v13   ;;  %70 = vperm.xlu0 %781, %v29_v14  }
  0x1e   :  { %79 = vperm.xlu1 %782, %v32_v15   ;;  %76 = vperm.xlu0 %781, %v31_v16  }
  0x81   :  { %v41_v38 = vpop.permute.xlu1 %40  ;;  %v35_v49 = vpop.permute.xlu0 %34 }
  0x82   :  { %vm106_vm0 = vcmp.eq.s32.totalorder %v41_v38, %v887_v30  ;;  %vm189_vm1 = vcmp.eq.s32.totalorder %v41_v38, %v889_v31  ;;  %vm271_vm2 = vcmp.eq.s32.totalorder %v41_v38, %v891_v32  ;;  %vm353_vm3 = vcmp.eq.s32.totalorder %v41_v38, %v893_v33 }
  0x83   :  { %vm435_vm4 = vcmp.eq.s32.totalorder %v41_v38, %v895_v34  ;;  %vm517_vm5 = vcmp.eq.s32.totalorder %v41_v38, %v897_v35  ;;  %vm599_vm6 = vcmp.eq.s32.totalorder %v41_v38, %v899_v36  ;;  %v949_v53 = vsel %vm106_vm0, %v84_v29, 2147483647 }
  0x84   :  { %2053 = vst [vmem:[#allocation9_spill] sm:$0xff] %v949_v53  ;;  %v951_v54 = vsel %vm189_vm1, %v84_v29, 2147483647  ;;  %vm681_vm7 = vcmp.eq.s32.totalorder %v41_v38, %v901_v37  ;;  %v957_v56 = vsel %vm271_vm2, %v84_v29, 2147483647  ;;  %vm104_vm8 = vcmp.eq.s32.totalorder %v35_v49, %v887_v30 }
  0x85   :  { %2054 = vst [vmem:[#allocation10_spill] sm:$0xff] %v951_v54  ;;  %2056 = vst [vmem:[#allocation12_spill] sm:$0xff] %v957_v56  ;;  %v959_v57 = vsel %vm353_vm3, %v84_v29, 2147483647  ;;  %vm187_vm9 = vcmp.eq.s32.totalorder %v35_v49, %v889_v31  ;;  %v963_v58 = vsel %vm435_vm4, %v84_v29, 2147483647  ;;  %vm269_vm10 = vcmp.eq.s32.totalorder %v35_v49, %v891_v32  ;;  %v44_v61 = vpop.permute.xlu1 %43  ;;  %v38_v5 = vpop.permute.xlu0 %37 }
  0x86   :  { %2057 = vst [vmem:[#allocation13_spill] sm:$0xff] %v959_v57  ;;  %2058 = vst [vmem:[#allocation14_spill] sm:$0xff] %v963_v58  ;;  %v965_v59 = vsel %vm517_vm5, %v84_v29, 2147483647  ;;  %v967_v60 = vsel %vm599_vm6, %v84_v29, 2147483647  ;;  %vm351_vm11 = vcmp.eq.s32.totalorder %v35_v49, %v893_v33  ;;  %vm433_vm12 = vcmp.eq.s32.totalorder %v35_v49, %v895_v34 }
  0x87   :  { %2059 = vst [vmem:[#allocation15_spill] sm:$0xff] %v965_v59  ;;  %2060 = vst [vmem:[#allocation16_spill] sm:$0xff] %v967_v60  ;;  %v970_v62 = vsel %vm681_vm7, %v84_v29, 2147483647  ;;  %vm515_vm13 = vcmp.eq.s32.totalorder %v35_v49, %v897_v35  ;;  %v976_v63 = vsel %vm104_vm8, %v873_v19, 2147483647  ;;  %vm597_vm14 = vcmp.eq.s32.totalorder %v35_v49, %v899_v36 }
  0x88   :  { %2061 = vst [vmem:[#allocation17_spill] sm:$0xff] %v970_v62  ;;  %v979_v0 = vsel %vm187_vm9, %v873_v19, 2147483647  ;;  %vm679_vm15 = vcmp.eq.s32.totalorder %v35_v49, %v901_v37  ;;  %v984_v1 = vsel %vm269_vm10, %v873_v19, 2147483647  ;;  %vm107_vm0 = vcmp.eq.s32.totalorder %v44_v61, %v887_v30 }
  0x89   :  { %vm190_vm1 = vcmp.eq.s32.totalorder %v44_v61, %v889_v31  ;;  %vm272_vm2 = vcmp.eq.s32.totalorder %v44_v61, %v891_v32  ;;  %v990_v2 = vsel %vm351_vm11, %v873_v19, 2147483647  ;;  %v993_v3 = vsel %vm433_vm12, %v873_v19, 2147483647  ;;  %v50_v14 = vpop.permute.xlu1 %49  ;;  %v47_v24 = vpop.permute.xlu0 %46 }
  0x8a   :  { %v996_v4 = vsel %vm515_vm13, %v873_v19, 2147483647  ;;  %vm354_vm3 = vcmp.eq.s32.totalorder %v44_v61, %v893_v33  ;;  %v1000_v6 = vsel %vm597_vm14, %v873_v19, 2147483647  ;;  %v1003_v7 = vsel %vm679_vm15, %v873_v19, 2147483647 }
  0x8b   :  { %vm436_vm4 = vcmp.eq.s32.totalorder %v44_v61, %v895_v34  ;;  %vm518_vm5 = vcmp.eq.s32.totalorder %v44_v61, %v897_v35  ;;  %v1008_v8 = vsel %vm107_vm0, %v904_v39, 2147483647  ;;  %v1011_v9 = vsel %vm190_vm1, %v904_v39, 2147483647 }
  0x8c   :  { %v1014_v10 = vsel %vm272_vm2, %v904_v39, 2147483647  ;;  %vm600_vm6 = vcmp.eq.s32.totalorder %v44_v61, %v899_v36  ;;  %v1018_v11 = vsel %vm354_vm3, %v904_v39, 2147483647  ;;  %vm682_vm7 = vcmp.eq.s32.totalorder %v44_v61, %v901_v37 }
  0x8d   :  { %vm105_vm8 = vcmp.eq.s32.totalorder %v38_v5, %v887_v30  ;;  %vm188_vm9 = vcmp.eq.s32.totalorder %v38_v5, %v889_v31  ;;  %v1024_v12 = vsel %vm436_vm4, %v904_v39, 2147483647  ;;  %v1027_v13 = vsel %vm518_vm5, %v904_v39, 2147483647  ;;  %v53_v60 = vpop.permute.xlu0 %52 }
  0x8e   :  { %2062 = vst [vmem:[#allocation18_spill] sm:$0xff] %v1027_v13  ;;  %vm270_vm10 = vcmp.eq.s32.totalorder %v38_v5, %v891_v32  ;;  %vm352_vm11 = vcmp.eq.s32.totalorder %v38_v5, %v893_v33  ;;  %v1032_v15 = vsel %vm600_vm6, %v904_v39, 2147483647  ;;  %vm434_vm12 = vcmp.eq.s32.totalorder %v38_v5, %v895_v34 }
  0x8f   :  { %2063 = vst [vmem:[#allocation19_spill] sm:$0xff] %v1032_v15  ;;  %vm516_vm13 = vcmp.eq.s32.totalorder %v38_v5, %v897_v35  ;;  %vm598_vm14 = vcmp.eq.s32.totalorder %v38_v5, %v899_v36  ;;  %v1038_v16 = vsel %vm682_vm7, %v904_v39, 2147483647  ;;  %v1041_v17 = vsel %vm105_vm8, %v907_v40, 2147483647 }
  0x90   :  { %2064 = vst [vmem:[#allocation20_spill] sm:$0xff] %v1038_v16  ;;  %v1044_v18 = vsel %vm188_vm9, %v907_v40, 2147483647  ;;  %vm680_vm15 = vcmp.eq.s32.totalorder %v38_v5, %v901_v37  ;;  %v1048_v19 = vsel %vm270_vm10, %v907_v40, 2147483647  ;;  %vm109_vm0 = vcmp.eq.s32.totalorder %v50_v14, %v887_v30 }
  0x91   :  { %v1051_v20 = vsel %vm352_vm11, %v907_v40, 2147483647  ;;  %vm192_vm1 = vcmp.eq.s32.totalorder %v50_v14, %v889_v31  ;;  %v1056_v21 = vsel %vm434_vm12, %v907_v40, 2147483647  ;;  %v1059_v22 = vsel %vm516_vm13, %v907_v40, 2147483647 }
  0x92   :  { %v1062_v23 = vsel %vm598_vm14, %v907_v40, 2147483647  ;;  %vm274_vm2 = vcmp.eq.s32.totalorder %v50_v14, %v891_v32  ;;  %v1066_v25 = vsel %vm680_vm15, %v907_v40, 2147483647  ;;  %vm356_vm3 = vcmp.eq.s32.totalorder %v50_v14, %v893_v33  ;;  %v56_v40 = vpop.permute.xlu1 %55 }
  0x93   :  { %vm438_vm4 = vcmp.eq.s32.totalorder %v50_v14, %v895_v34  ;;  %vm520_vm5 = vcmp.eq.s32.totalorder %v50_v14, %v897_v35  ;;  %v1072_v26 = vsel %vm109_vm0, %v910_v41, 2147483647  ;;  %v1075_v27 = vsel %vm192_vm1, %v910_v41, 2147483647 }
  0x94   :  { %vm602_vm6 = vcmp.eq.s32.totalorder %v50_v14, %v899_v36  ;;  %vm684_vm7 = vcmp.eq.s32.totalorder %v50_v14, %v901_v37  ;;  %v1080_v28 = vsel %vm274_vm2, %v910_v41, 2147483647  ;;  %vm108_vm8 = vcmp.eq.s32.totalorder %v47_v24, %v887_v30 }
  0x95   :  { %vm191_vm9 = vcmp.eq.s32.totalorder %v47_v24, %v889_v31  ;;  %vm273_vm10 = vcmp.eq.s32.totalorder %v47_v24, %v891_v32  ;;  %v1086_v29 = vsel %vm356_vm3, %v910_v41, 2147483647  ;;  %v1089_v38 = vsel %vm438_vm4, %v910_v41, 2147483647 }
  0x96   :  { %v1092_v39 = vsel %vm520_vm5, %v910_v41, 2147483647  ;;  %vm355_vm11 = vcmp.eq.s32.totalorder %v47_v24, %v893_v33  ;;  %v1096_v49 = vsel %vm602_vm6, %v910_v41, 2147483647  ;;  %v1099_v61 = vsel %vm684_vm7, %v910_v41, 2147483647  ;;  %v1159_v56 = vpop.permute.xlu1 %61 }
  0x97   :  { %vm437_vm12 = vcmp.eq.s32.totalorder %v47_v24, %v895_v34  ;;  %vm519_vm13 = vcmp.eq.s32.totalorder %v47_v24, %v897_v35  ;;  %v1104_v5 = vsel %vm108_vm8, %v913_v42, 2147483647  ;;  %v1107_v14 = vsel %vm191_vm9, %v913_v42, 2147483647 }
  0x98   :  { %v1110_v55 = vsel %vm273_vm10, %v913_v42, 2147483647  ;;  %vm601_vm14 = vcmp.eq.s32.totalorder %v47_v24, %v899_v36  ;;  %vm138_vm15 = vcmp.lt.s32.totalorder %v1041_v17, %v1072_v26  ;;  %v1116_v41 = vsel %vm355_vm11, %v913_v42, 2147483647 }
  0x99   :  { %vm683_vm0 = vcmp.eq.s32.totalorder %v47_v24, %v901_v37  ;;  %vm111_vm1 = vcmp.eq.s32.totalorder %v56_v40, %v887_v30  ;;  %vm194_vm2 = vcmp.eq.s32.totalorder %v56_v40, %v889_v31  ;;  %v1122_v52 = vsel %vm437_vm12, %v913_v42, 2147483647 }
  0x9a   :  { %v1125_v62 = vsel %vm519_vm13, %v913_v42, 2147483647  ;;  %vm276_vm3 = vcmp.eq.s32.totalorder %v56_v40, %v891_v32  ;;  %vm358_vm4 = vcmp.eq.s32.totalorder %v56_v40, %v893_v33  ;;  %vm221_vm5 = vcmp.lt.s32.totalorder %v1044_v18, %v1075_v27 }
  0x9b   :  { %vm303_vm6 = vcmp.lt.s32.totalorder %v1048_v19, %v1080_v28  ;;  %v1134_v59 = vsel %vm601_vm14, %v913_v42, 2147483647  ;;  %vm440_vm7 = vcmp.eq.s32.totalorder %v56_v40, %v895_v34  ;;  %vm522_vm8 = vcmp.eq.s32.totalorder %v56_v40, %v897_v35 }
  0x9c   :  { %vm604_vm9 = vcmp.eq.s32.totalorder %v56_v40, %v899_v36  ;;  %vm385_vm10 = vcmp.lt.s32.totalorder %v1051_v20, %v1086_v29  ;;  %vm467_vm11 = vcmp.lt.s32.totalorder %v1056_v21, %v1089_v38  ;;  %v1146_v58 = vsel %vm683_vm0, %v913_v42, 2147483647 }
  0x9d   :  { %v1151_v51 = vsel %vm111_vm1, %v916_v43, 2147483647  ;;  %v1156_v57 = vsel %vm194_vm2, %v916_v43, 2147483647  ;;  %vm686_vm12 = vcmp.eq.s32.totalorder %v56_v40, %v901_v37  ;;  %v1168_v42 = vsel %vm276_vm3, %v916_v43, 2147483647 }
  0x9e   :  { %v1173_v24 = vsel %vm358_vm4, %v916_v43, 2147483647  ;;  %vm110_vm0 = vcmp.eq.s32.totalorder %v53_v60, %v887_v30  ;;  %vm193_vm1 = vcmp.eq.s32.totalorder %v53_v60, %v889_v31  ;;  %v1184_v54 = vsel %vm440_vm7, %v916_v43, 2147483647 }
  0x9f   :  { %v1189_v53 = vsel %vm522_vm8, %v916_v43, 2147483647  ;;  %v1194_v50 = vsel %vm604_vm9, %v916_v43, 2147483647  ;;  %vm275_vm3 = vcmp.eq.s32.totalorder %v53_v60, %v891_v32  ;;  %v1208_v16 = vsel %vm686_vm12, %v916_v43, 2147483647 }
  0xa0   :  { %2065 = vst [vmem:[#allocation21_spill] sm:$0xff] %v1189_v53  ;;  %2066 = vst [vmem:[#allocation22_spill] sm:$0xff] %v1194_v50  ;;  %vm357_vm9 = vcmp.eq.s32.totalorder %v53_v60, %v893_v33  ;;  %vm439_vm2 = vcmp.eq.s32.totalorder %v53_v60, %v895_v34  ;;  %vm113_vm4 = vcmp.eq.s32.totalorder %v1159_v56, %v887_v30  ;;  %v1219_v15 = vsel %vm110_vm0, %v919_v44, 2147483647  ;;  %v1275_v50 = vpop.permute.xlu1 %67  ;;  %v59_v53 = vpop.permute.xlu0 %58 }
  0xa1   :  { %2067 = vst [vmem:[#allocation23_spill] sm:$0xff] %v1208_v16  ;;  %2068 = vst [vmem:[#allocation24_spill] sm:$0xff] %v1219_v15  ;;  %v1224_v43 = vsel %vm193_vm1, %v919_v44, 2147483647  ;;  %vm521_vm12 = vcmp.eq.s32.totalorder %v53_v60, %v897_v35  ;;  %vm603_vm8 = vcmp.eq.s32.totalorder %v53_v60, %v899_v36  ;;  %vm629_vm7 = vcmp.lt.s32.totalorder %v1000_v6, %v1134_v59 }
  0xa2   :  { %2069 = vst [vmem:[#allocation25_spill] sm:$0xff] %v1224_v43  ;;  %v1231_v40 = vsel %vm275_vm3, %v919_v44, 2147483647  ;;  %vm685_vm14 = vcmp.eq.s32.totalorder %v53_v60, %v901_v37  ;;  %vm196_vm0 = vcmp.eq.s32.totalorder %v1159_v56, %v889_v31  ;;  %vm278_vm13 = vcmp.eq.s32.totalorder %v1159_v56, %v891_v32 }
  0xa3   :  { %2070 = vst [vmem:[#allocation26_spill] sm:$0xff] %v1231_v40  ;;  %v1239_v43 = vsel %vm357_vm9, %v919_v44, 2147483647  ;;  %v1242_v15 = vsel %vm439_vm2, %v919_v44, 2147483647  ;;  %vm360_vm1 = vcmp.eq.s32.totalorder %v1159_v56, %v893_v33  ;;  %vm442_vm3 = vcmp.eq.s32.totalorder %v1159_v56, %v895_v34 }
  0xa4   :  { %2071 = vst [vmem:[#allocation27_spill] sm:$0xff] %v1239_v43  ;;  %2072 = vst [vmem:[#allocation28_spill] sm:$0xff] %v1242_v15  ;;  %v1245_v16 = vsel %vm113_vm4, %v922_v45, 2147483647  ;;  %v1250_v60 = vsel %vm521_vm12, %v919_v44, 2147483647  ;;  %vm524_vm9 = vcmp.eq.s32.totalorder %v1159_v56, %v897_v35  ;;  %vm711_vm2 = vcmp.lt.s32.totalorder %v1003_v7, %v1146_v58 }
  0xa5   :  { %2073 = vst [vmem:[#allocation29_spill] sm:$0xff] %v1250_v60  ;;  %v1253_v40 = vsel %vm603_vm8, %v919_v44, 2147483647  ;;  %v1262_v15 = vsel %vm685_vm14, %v919_v44, 2147483647  ;;  %v139_v60 = vsel %vm138_vm15, %v1041_v17, %v1072_v26  ;;  %vm606_vm14 = vcmp.eq.s32.totalorder %v1159_v56, %v899_v36 }
  0xa6   :  { %2074 = vst [vmem:[#allocation30_spill] sm:$0xff] %v1253_v40  ;;  %2075 = vst [vmem:[#allocation31_spill] sm:$0xff] %v1262_v15  ;;  %v1270_v40 = vsel %vm196_vm0, %v922_v45, 2147483647  ;;  %v1273_v43 = vsel %vm278_vm13, %v922_v45, 2147483647  ;;  %vm146_vm4 = vcmp.lt.s32.totalorder %v139_v60, %v1245_v16  ;;  %vm688_vm8 = vcmp.eq.s32.totalorder %v1159_v56, %v901_v37 }
  0xa7   :  { %v1279_v13 = vsel %vm360_vm1, %v922_v45, 2147483647  ;;  %v222_v44 = vsel %vm221_vm5, %v1044_v18, %v1075_v27  ;;  %v304_v17 = vsel %vm303_vm6, %v1048_v19, %v1080_v28  ;;  %v1296_v26 = vsel %vm442_vm3, %v922_v45, 2147483647  ;;  %v1384_v28 = vpop.permute.xlu1 %73 }
  0xa8   :  { %v1299_v15 = vsel %vm524_vm9, %v922_v45, 2147483647  ;;  %vm229_vm15 = vcmp.lt.s32.totalorder %v222_v44, %v1270_v40  ;;  %vm311_vm13 = vcmp.lt.s32.totalorder %v304_v17, %v1273_v43  ;;  %v386_v56 = vsel %vm385_vm10, %v1051_v20, %v1086_v29 }
  0xa9   :  { %v1313_v18 = vsel %vm467_vm11, %v1056_v21, %v1089_v38  ;;  %vm393_vm5 = vcmp.lt.s32.totalorder %v386_v56, %v1279_v13  ;;  %vm2076_vm6 = vcmp.lt.s32.totalorder %v1059_v22, %v1092_v39  ;;  %v1324_v27 = vsel %vm606_vm14, %v922_v45, 2147483647 }
  0xaa   :  { %v1321_v19 = vsel %vm2076_vm6, %v1059_v22, %v1092_v39  ;;  %vm2077_vm10 = vcmp.lt.s32.totalorder %v1062_v23, %v1096_v49  ;;  %v1334_v21 = vsel %vm688_vm8, %v922_v45, 2147483647  ;;  %vm2078_vm0 = vcmp.lt.s32.totalorder %v1066_v25, %v1099_v61  ;;  %v1452_v39 = vpop.permute.xlu0 %64 }
  0xab   :  { %v1331_v20 = vsel %vm2077_vm10, %v1062_v23, %v1096_v49  ;;  %v1345_v22 = vsel %vm2078_vm0, %v1066_v25, %v1099_v61  ;;  %vm2079_vm1 = vcmp.lt.s32.totalorder %v976_v63, %v1104_v5  ;;  %vm112_vm3 = vcmp.eq.s32.totalorder %v59_v53, %v887_v30 }
  0xac   :  { %v1352_v45 = vsel %vm2079_vm1, %v976_v63, %v1104_v5  ;;  %vm195_vm9 = vcmp.eq.s32.totalorder %v59_v53, %v889_v31  ;;  %vm2080_vm14 = vcmp.lt.s32.totalorder %v979_v0, %v1107_v14  ;;  %vm2081_vm8 = vcmp.lt.s32.totalorder %v984_v1, %v1110_v55 }
  0xad   :  { %v1361_v23 = vsel %vm2080_vm14, %v979_v0, %v1107_v14  ;;  %v1368_v25 = vsel %vm2081_vm8, %v984_v1, %v1110_v55  ;;  %vm2082_vm6 = vcmp.lt.s32.totalorder %v990_v2, %v1116_v41  ;;  %vm2083_vm10 = vcmp.lt.s32.totalorder %v993_v3, %v1122_v52 }
  0xae   :  { %v1375_v63 = vsel %vm2082_vm6, %v990_v2, %v1116_v41  ;;  %v1382_v0 = vsel %vm2083_vm10, %v993_v3, %v1122_v52  ;;  %vm2084_vm0 = vcmp.lt.s32.totalorder %v996_v4, %v1125_v62  ;;  %vm277_vm1 = vcmp.eq.s32.totalorder %v59_v53, %v891_v32 }
  0xaf   :  { %v1391_v55 = vsel %vm2084_vm0, %v996_v4, %v1125_v62  ;;  %vm359_vm14 = vcmp.eq.s32.totalorder %v59_v53, %v893_v33  ;;  %vm441_vm8 = vcmp.eq.s32.totalorder %v59_v53, %v895_v34  ;;  %v1403_v52 = vsel %vm629_vm7, %v1000_v6, %v1134_v59 }
  0xb0   :  { %v1406_v1 = vsel %vm112_vm3, %v925_v46, 2147483647  ;;  %v1409_v62 = vsel %vm195_vm9, %v925_v46, 2147483647  ;;  %vm523_vm10 = vcmp.eq.s32.totalorder %v59_v53, %v897_v35  ;;  %vm721_vm0 = vcmp.lt.s32.totalorder %v1345_v22, %v1334_v21 }
  0xb1   :  { %vm605_vm6 = vcmp.eq.s32.totalorder %v59_v53, %v899_v36  ;;  %vm687_vm12 = vcmp.eq.s32.totalorder %v59_v53, %v901_v37  ;;  %vm117_vm11 = vcmp.eq.s32.totalorder %v1384_v28, %v887_v30  ;;  %vm200_vm7 = vcmp.eq.s32.totalorder %v1384_v28, %v889_v31 }
  0xb2   :  { %v1421_v59 = vsel %vm277_vm1, %v925_v46, 2147483647  ;;  %v1424_v2 = vsel %vm359_vm14, %v925_v46, 2147483647  ;;  %v1427_v3 = vsel %vm441_vm8, %v925_v46, 2147483647  ;;  %vm282_vm3 = vcmp.eq.s32.totalorder %v1384_v28, %v891_v32 }
  0xb3   :  { %v1436_v53 = vsel %vm711_vm2, %v1003_v7, %v1146_v58  ;;  %v1439_v4 = vsel %vm523_vm10, %v925_v46, 2147483647  ;;  %v133_v6 = vsel %vm117_vm11, %v930_v47, 2147483647  ;;  %vm364_vm9 = vcmp.eq.s32.totalorder %v1384_v28, %v893_v33 }
  0xb4   :  { %vm144_vm1 = vcmp.lt.s32.totalorder %v1352_v45, %v1406_v1  ;;  %v1447_v29 = vsel %vm605_vm6, %v925_v46, 2147483647  ;;  %v1450_v38 = vsel %vm687_vm12, %v925_v46, 2147483647  ;;  %v147_v58 = vsel %vm146_vm4, %v139_v60, %v1245_v16 }
  0xb5   :  { %v216_v7 = vsel %vm200_vm7, %v930_v47, 2147483647  ;;  %vm227_vm2 = vcmp.lt.s32.totalorder %v1361_v23, %v1409_v62  ;;  %vm309_vm11 = vcmp.lt.s32.totalorder %v1368_v25, %v1421_v59  ;;  %v230_v46 = vsel %vm229_vm15, %v222_v44, %v1270_v40  ;;  %v71_v44 = vpop.permute.xlu0 %70 }
  0xb6   :  { %v298_v16 = vsel %vm282_vm3, %v930_v47, 2147483647  ;;  %v380_v49 = vsel %vm364_vm9, %v930_v47, 2147483647  ;;  %vm446_vm4 = vcmp.eq.s32.totalorder %v1384_v28, %v895_v34  ;;  %vm154_vm8 = vcmp.lt.s32.totalorder %v147_v58, %v133_v6 }
  0xb7   :  { %v312_v61 = vsel %vm311_vm13, %v304_v17, %v1273_v43  ;;  %v462_v5 = vsel %vm446_vm4, %v930_v47, 2147483647  ;;  %vm528_vm15 = vcmp.eq.s32.totalorder %v1384_v28, %v897_v35  ;;  %vm237_vm6 = vcmp.lt.s32.totalorder %v230_v46, %v216_v7 }
  0xb8   :  { %v394_v14 = vsel %vm393_vm5, %v386_v56, %v1279_v13  ;;  %v544_v41 = vsel %vm528_vm15, %v930_v47, 2147483647  ;;  %vm610_vm10 = vcmp.eq.s32.totalorder %v1384_v28, %v899_v36  ;;  %vm319_vm7 = vcmp.lt.s32.totalorder %v312_v61, %v298_v16 }
  0xb9   :  { %vm401_vm3 = vcmp.lt.s32.totalorder %v394_v14, %v380_v49  ;;  %vm2085_vm13 = vcmp.lt.s32.totalorder %v1313_v18, %v1296_v26  ;;  %vm2086_vm9 = vcmp.lt.s32.totalorder %v1321_v19, %v1299_v15  ;;  %vm555_vm5 = vcmp.lt.s32.totalorder %v1391_v55, %v1439_v4 }
  0xba   :  { %v476_v43 = vsel %vm2085_vm13, %v1313_v18, %v1296_v26  ;;  %v558_v40 = vsel %vm2086_vm9, %v1321_v19, %v1299_v15  ;;  %v626_v13 = vsel %vm610_vm10, %v930_v47, 2147483647  ;;  %vm692_vm12 = vcmp.eq.s32.totalorder %v1384_v28, %v901_v37 }
  0xbb   :  { %vm483_vm4 = vcmp.lt.s32.totalorder %v476_v43, %v462_v5  ;;  %vm565_vm15 = vcmp.lt.s32.totalorder %v558_v40, %v544_v41  ;;  %vm637_vm14 = vcmp.lt.s32.totalorder %v1403_v52, %v1447_v29  ;;  %vm719_vm13 = vcmp.lt.s32.totalorder %v1436_v53, %v1450_v38 }
  0xbc   :  { %v1508_v60 = vsel %vm154_vm8, %v147_v58, %v133_v6  ;;  %v1511_v15 = vsel %vm237_vm6, %v230_v46, %v216_v7  ;;  %v1515_v17 = vsel %vm319_vm7, %v312_v61, %v298_v16  ;;  %v1517_v26 = vsel %vm401_vm3, %v394_v14, %v380_v49  ;;  %v2090_v16 = vld [vmem:[#allocation21_spill] sm:$0xff] }
  0xbd   :  { %vm2087_vm10 = vcmp.lt.s32.totalorder %v1331_v20, %v1324_v27  ;;  %v708_v18 = vsel %vm692_vm12, %v930_v47, 2147483647  ;;  %v1532_v19 = vsel %vm483_vm4, %v476_v43, %v462_v5  ;;  %v1535_v28 = vsel %vm565_vm15, %v558_v40, %v544_v41 }
  0xbe   :  { %v640_v56 = vsel %vm2087_vm10, %v1331_v20, %v1324_v27  ;;  %v722_v47 = vsel %vm721_vm0, %v1345_v22, %v1334_v21  ;;  %vm307_vm12 = vcmp.lt.s32.totalorder %v1014_v10, %v1168_v42  ;;  %vm280_vm10 = vcmp.eq.s32.totalorder %v1275_v50, %v891_v32 }
  0xbf   :  { %vm647_vm3 = vcmp.lt.s32.totalorder %v640_v56, %v626_v13  ;;  %vm116_vm6 = vcmp.eq.s32.totalorder %v71_v44, %v887_v30  ;;  %vm199_vm4 = vcmp.eq.s32.totalorder %v71_v44, %v889_v31  ;;  %vm281_vm15 = vcmp.eq.s32.totalorder %v71_v44, %v891_v32 }
  0xc0   :  { %vm363_vm7 = vcmp.eq.s32.totalorder %v71_v44, %v893_v33  ;;  %vm729_vm9 = vcmp.lt.s32.totalorder %v722_v47, %v708_v18  ;;  %v132_v27 = vsel %vm116_vm6, %v933_v48, 2147483647  ;;  %v215_v20 = vsel %vm199_vm4, %v933_v48, 2147483647 }
  0xc1   :  { %v297_v21 = vsel %vm281_vm15, %v933_v48, 2147483647  ;;  %v1557_v22 = vsel %vm647_vm3, %v640_v56, %v626_v13  ;;  %v145_v6 = vsel %vm144_vm1, %v1352_v45, %v1406_v1  ;;  %v379_v58 = vsel %vm363_vm7, %v933_v48, 2147483647 }
  0xc2   :  { %vm445_vm8 = vcmp.eq.s32.totalorder %v71_v44, %v895_v34  ;;  %v228_v7 = vsel %vm227_vm2, %v1361_v23, %v1409_v62  ;;  %v310_v45 = vsel %vm309_vm11, %v1368_v25, %v1421_v59  ;;  %vm2088_vm1 = vcmp.lt.s32.totalorder %v1375_v63, %v1424_v2  ;;  %v2091_v23 = vld [vmem:[#allocation18_spill] sm:$0xff]  ;;  %v2094_v59 = vld [vmem:[#allocation23_spill] sm:$0xff] }
  0xc3   :  { %v392_v1 = vsel %vm2088_vm1, %v1375_v63, %v1424_v2  ;;  %vm2089_vm7 = vcmp.lt.s32.totalorder %v1382_v0, %v1427_v3  ;;  %v1597_v25 = vsel %vm729_vm9, %v722_v47, %v708_v18  ;;  %vm152_vm11 = vcmp.lt.s32.totalorder %v145_v6, %v132_v27  ;;  %v2092_v62 = vld [vmem:[#allocation22_spill] sm:$0xff]  ;;  %v2093_v63 = vld [vmem:[#allocation19_spill] sm:$0xff]  ;;  %v2095_v2 = vld [vmem:[#allocation20_spill] sm:$0xff] }
  0xc4   :  { %v474_v46 = vsel %vm2089_vm7, %v1382_v0, %v1427_v3  ;;  %vm235_vm3 = vcmp.lt.s32.totalorder %v228_v7, %v215_v20  ;;  %vm317_vm4 = vcmp.lt.s32.totalorder %v310_v45, %v297_v21  ;;  %vm717_vm6 = vcmp.lt.s32.totalorder %v2095_v2, %v2094_v59 }
  0xc5   :  { %vm690_vm7 = vcmp.eq.s32.totalorder %v1275_v50, %v901_v37  ;;  %vm399_vm0 = vcmp.lt.s32.totalorder %v392_v1, %v379_v58  ;;  %v461_v0 = vsel %vm445_vm8, %v933_v48, 2147483647  ;;  %vm527_vm9 = vcmp.eq.s32.totalorder %v71_v44, %v897_v35 }
  0xc6   :  { %vm609_vm15 = vcmp.eq.s32.totalorder %v71_v44, %v899_v36  ;;  %vm481_vm2 = vcmp.lt.s32.totalorder %v474_v46, %v461_v0  ;;  %v543_v3 = vsel %vm527_vm9, %v933_v48, 2147483647  ;;  %vm691_vm1 = vcmp.eq.s32.totalorder %v71_v44, %v901_v37 }
  0xc7   :  { %v625_v49 = vsel %vm609_vm15, %v933_v48, 2147483647  ;;  %v556_v61 = vsel %vm555_vm5, %v1391_v55, %v1439_v4  ;;  %v638_v5 = vsel %vm637_vm14, %v1403_v52, %v1447_v29  ;;  %v720_v14 = vsel %vm719_vm13, %v1436_v53, %v1450_v38  ;;  %v2096_v29 = vld [vmem:[#allocation6_spill] sm:$0xff] }
  0xc8   :  { %v707_v41 = vsel %vm691_vm1, %v933_v48, 2147483647  ;;  %v1630_v43 = vsel %vm152_vm11, %v145_v6, %v132_v27  ;;  %v1633_v40 = vsel %vm235_vm3, %v228_v7, %v215_v20  ;;  %v1636_v55 = vsel %vm317_vm4, %v310_v45, %v297_v21  ;;  %v2104_v27 = vld [vmem:[#allocation9_spill] sm:$0xff]  ;;  %v80_v7 = vpop.permute.xlu1 %79 }
  0xc9   :  { %v1638_v4 = vsel %vm399_vm0, %v392_v1, %v379_v58  ;;  %v1640_v52 = vsel %vm481_vm2, %v474_v46, %v461_v0  ;;  %vm563_vm14 = vcmp.lt.s32.totalorder %v556_v61, %v543_v3  ;;  %vm645_vm5 = vcmp.lt.s32.totalorder %v638_v5, %v625_v49 }
  0xca   :  { %vm2097_vm13 = vcmp.eq.s32.totalorder %v1275_v50, %v887_v30  ;;  %vm727_vm8 = vcmp.lt.s32.totalorder %v720_v14, %v707_v41  ;;  %vm2098_vm3 = vcmp.lt.s32.totalorder %v1008_v8, %v1151_v51  ;;  %vm2099_vm0 = vcmp.eq.s32.totalorder %v1275_v50, %v889_v31 }
  0xcb   :  { %v131_v48 = vsel %vm2097_vm13, %v2096_v29, 2147483647  ;;  %v143_v53 = vsel %vm2098_vm3, %v1008_v8, %v1151_v51  ;;  %v214_v38 = vsel %vm2099_vm0, %v2096_v29, 2147483647  ;;  %vm2100_vm4 = vcmp.lt.s32.totalorder %v1011_v9, %v1156_v57 }
  0xcc   :  { %v226_v13 = vsel %vm2100_vm4, %v1011_v9, %v1156_v57  ;;  %vm150_vm2 = vcmp.lt.s32.totalorder %v143_v53, %v131_v48  ;;  %v296_v44 = vsel %vm280_vm10, %v2096_v29, 2147483647  ;;  %v308_v51 = vsel %vm307_vm12, %v1014_v10, %v1168_v42  ;;  %v2103_v42 = vld [vmem:[#allocation24_spill] sm:$0xff] }
  0xcd   :  { %vm233_vm15 = vcmp.lt.s32.totalorder %v226_v13, %v214_v38  ;;  %v1669_v8 = vsel %vm563_vm14, %v556_v61, %v543_v3  ;;  %v1671_v56 = vsel %vm645_vm5, %v638_v5, %v625_v49  ;;  %vm315_vm11 = vcmp.lt.s32.totalorder %v308_v51, %v296_v44  ;;  %v2118_v61 = vld [vmem:[#allocation28_spill] sm:$0xff]  ;;  %v2119_v5 = vld [vmem:[#allocation14_spill] sm:$0xff] }
  0xce   :  { %vm2101_vm1 = vcmp.eq.s32.totalorder %v1275_v50, %v893_v33  ;;  %v1677_v9 = vsel %vm727_vm8, %v720_v14, %v707_v41  ;;  %v151_v18 = vsel %vm150_vm2, %v143_v53, %v131_v48  ;;  %v1679_v47 = vsel %vm233_vm15, %v226_v13, %v214_v38  ;;  %v2120_v53 = vld [vmem:[#allocation29_spill] sm:$0xff]  ;;  %v2121_v38 = vld [vmem:[#allocation15_spill] sm:$0xff]  ;;  %v2122_v13 = vld [vmem:[#allocation30_spill] sm:$0xff] }
  0xcf   :  { %v378_v57 = vsel %vm2101_vm1, %v2096_v29, 2147483647  ;;  %vm2102_vm10 = vcmp.eq.s32.totalorder %v1275_v50, %v895_v34  ;;  %vm140_vm12 = vcmp.lt.s32.totalorder %v2104_v27, %v2103_v42  ;;  %vm114_vm9 = vcmp.eq.s32.totalorder %v1452_v39, %v887_v30 }
  0xd0   :  { %v460_v10 = vsel %vm2102_vm10, %v2096_v29, 2147483647  ;;  %v1689_v20 = vsel %vm315_vm11, %v308_v51, %v296_v44  ;;  %vm2105_vm14 = vcmp.lt.s32.totalorder %v1018_v11, %v1173_v24  ;;  %vm2106_vm5 = vcmp.lt.s32.totalorder %v1024_v12, %v1184_v54  ;;  %v2123_v44 = vld [vmem:[#allocation16_spill] sm:$0xff] }
  0xd1   :  { %v390_v21 = vsel %vm2105_vm14, %v1018_v11, %v1173_v24  ;;  %v472_v6 = vsel %vm2106_vm5, %v1024_v12, %v1184_v54  ;;  %vm2107_vm13 = vcmp.eq.s32.totalorder %v1275_v50, %v897_v35  ;;  %vm2108_vm0 = vcmp.lt.s32.totalorder %v2091_v23, %v2090_v16  ;;  %v2110_v54 = vld [vmem:[#allocation25_spill] sm:$0xff]  ;;  %v2111_v12 = vld [vmem:[#allocation10_spill] sm:$0xff] }
  0xd2   :  { %v542_v58 = vsel %vm2107_vm13, %v2096_v29, 2147483647  ;;  %vm397_vm8 = vcmp.lt.s32.totalorder %v390_v21, %v378_v57  ;;  %vm479_vm3 = vcmp.lt.s32.totalorder %v472_v6, %v460_v10  ;;  %v554_v11 = vsel %vm2108_vm0, %v2091_v23, %v2090_v16  ;;  %v2113_v16 = vld [vmem:[#allocation26_spill] sm:$0xff]  ;;  %v2114_v23 = vld [vmem:[#allocation12_spill] sm:$0xff] }
  0xd3   :  { %vm2109_vm4 = vcmp.eq.s32.totalorder %v1275_v50, %v899_v36  ;;  %vm223_vm2 = vcmp.lt.s32.totalorder %v2111_v12, %v2110_v54  ;;  %vm197_vm15 = vcmp.eq.s32.totalorder %v1452_v39, %v889_v31  ;;  %vm561_vm11 = vcmp.lt.s32.totalorder %v554_v11, %v542_v58  ;;  %v2115_v50 = vld [vmem:[#allocation27_spill] sm:$0xff] }
  0xd4   :  { %v624_v24 = vsel %vm2109_vm4, %v2096_v29, 2147483647  ;;  %vm2112_vm1 = vcmp.lt.s32.totalorder %v2093_v63, %v2092_v62  ;;  %v706_v1 = vsel %vm690_vm7, %v2096_v29, 2147483647  ;;  %v718_v46 = vsel %vm717_vm6, %v2095_v2, %v2094_v59  ;;  %v2117_v2 = vld [vmem:[#allocation7_spill] sm:$0xff] }
  0xd5   :  { %v636_v45 = vsel %vm2112_vm1, %v2093_v63, %v2092_v62  ;;  %vm725_vm0 = vcmp.lt.s32.totalorder %v718_v46, %v706_v1  ;;  %vm119_vm4 = vcmp.eq.s32.totalorder %v80_v7, %v887_v30  ;;  %vm202_vm7 = vcmp.eq.s32.totalorder %v80_v7, %v889_v31  ;;  %v2116_v62 = vld [vmem:[#allocation13_spill] sm:$0xff] }
  0xd6   :  { %vm643_vm13 = vcmp.lt.s32.totalorder %v636_v45, %v624_v24  ;;  %v398_v63 = vsel %vm397_vm8, %v390_v21, %v378_v57  ;;  %v480_v59 = vsel %vm479_vm3, %v472_v6, %v460_v10  ;;  %v135_v0 = vsel %vm119_vm4, %v2117_v2, 2147483647  ;;  %v2124_v21 = vld [vmem:[#allocation31_spill] sm:$0xff] }
  0xd7   :  { %v218_v3 = vsel %vm202_vm7, %v2117_v2, 2147483647  ;;  %v562_v49 = vsel %vm561_vm11, %v554_v11, %v542_v58  ;;  %vm158_vm6 = vcmp.lt.s32.totalorder %v151_v18, %v135_v0  ;;  %vm284_vm8 = vcmp.eq.s32.totalorder %v80_v7, %v891_v32 }
  0xd8   :  { %vm366_vm3 = vcmp.eq.s32.totalorder %v80_v7, %v893_v33  ;;  %v644_v14 = vsel %vm643_vm13, %v636_v45, %v624_v24  ;;  %v726_v41 = vsel %vm725_vm0, %v718_v46, %v706_v1  ;;  %v300_v29 = vsel %vm284_vm8, %v2117_v2, 2147483647  ;;  %v2126_v24 = vld [vmem:[#allocation8_spill] sm:$0xff] }
  0xd9   :  { %v382_v48 = vsel %vm366_vm3, %v2117_v2, 2147483647  ;;  %vm241_vm1 = vcmp.lt.s32.totalorder %v1679_v47, %v218_v3  ;;  %vm323_vm7 = vcmp.lt.s32.totalorder %v1689_v20, %v300_v29  ;;  %vm448_vm13 = vcmp.eq.s32.totalorder %v80_v7, %v895_v34 }
  0xda   :  { %vm530_vm0 = vcmp.eq.s32.totalorder %v80_v7, %v897_v35  ;;  %v1780_v51 = vsel %vm158_vm6, %v151_v18, %v135_v0  ;;  %vm405_vm10 = vcmp.lt.s32.totalorder %v398_v63, %v382_v48  ;;  %v464_v57 = vsel %vm448_vm13, %v2117_v2, 2147483647  ;;  %v2125_v18 = vld [vmem:[#allocation17_spill] sm:$0xff] }
  0xdb   :  { %v546_v10 = vsel %vm530_vm0, %v2117_v2, 2147483647  ;;  %vm571_vm11 = vcmp.lt.s32.totalorder %v1669_v8, %v1535_v28  ;;  %vm487_vm14 = vcmp.lt.s32.totalorder %v480_v59, %v464_v57  ;;  %vm612_vm8 = vcmp.eq.s32.totalorder %v80_v7, %v899_v36 }
  0xdc   :  { %vm569_vm5 = vcmp.lt.s32.totalorder %v562_v49, %v546_v10  ;;  %vm694_vm3 = vcmp.eq.s32.totalorder %v80_v7, %v901_v37  ;;  %vm715_vm6 = vcmp.lt.s32.totalorder %v2125_v18, %v2124_v21  ;;  %vm689_vm13 = vcmp.eq.s32.totalorder %v1452_v39, %v901_v37 }
  0xdd   :  { %v1797_v6 = vsel %vm241_vm1, %v1679_v47, %v218_v3  ;;  %v1802_v58 = vsel %vm323_vm7, %v1689_v20, %v300_v29  ;;  %v628_v11 = vsel %vm612_vm8, %v2117_v2, 2147483647  ;;  %v710_v7 = vsel %vm694_vm3, %v2117_v2, 2147483647 }
  0xde   :  { %vm651_vm0 = vcmp.lt.s32.totalorder %v644_v14, %v628_v11  ;;  %vm733_vm4 = vcmp.lt.s32.totalorder %v726_v41, %v710_v7  ;;  %v130_v45 = vsel %vm114_vm9, %v2126_v24, 2147483647  ;;  %v141_v47 = vsel %vm140_vm12, %v2104_v27, %v2103_v42 }
  0xdf   :  { %v1816_v20 = vsel %vm405_vm10, %v398_v63, %v382_v48  ;;  %v1818_v1 = vsel %vm487_vm14, %v480_v59, %v464_v57  ;;  %v1820_v46 = vsel %vm569_vm5, %v562_v49, %v546_v10  ;;  %vm148_vm1 = vcmp.lt.s32.totalorder %v141_v47, %v130_v45 }
  0xe0   :  { %v1822_v2 = vsel %vm651_vm0, %v644_v14, %v628_v11  ;;  %v1824_v0 = vsel %vm733_vm4, %v726_v41, %v710_v7  ;;  %v213_v3 = vsel %vm197_vm15, %v2126_v24, 2147483647  ;;  %v224_v42 = vsel %vm223_vm2, %v2111_v12, %v2110_v54 }
  0xe1   :  { %vm2127_vm12 = vcmp.lt.s32.totalorder %v1630_v43, %v1508_v60  ;;  %vm231_vm9 = vcmp.lt.s32.totalorder %v224_v42, %v213_v3  ;;  %vm2128_vm10 = vcmp.eq.s32.totalorder %v1452_v39, %v891_v32  ;;  %vm2129_vm15 = vcmp.lt.s32.totalorder %v2114_v23, %v2113_v16 }
  0xe2   :  { %v161_v27 = vsel %vm2127_vm12, %v1630_v43, %v1508_v60  ;;  %v295_v63 = vsel %vm2128_vm10, %v2126_v24, 2147483647  ;;  %v306_v59 = vsel %vm2129_vm15, %v2114_v23, %v2113_v16  ;;  %v149_v49 = vsel %vm148_vm1, %v141_v47, %v130_v45 }
  0xe3   :  { %vm313_vm2 = vcmp.lt.s32.totalorder %v306_v59, %v295_v63  ;;  %vm2130_vm14 = vcmp.eq.s32.totalorder %v1452_v39, %v893_v33  ;;  %vm2131_vm5 = vcmp.lt.s32.totalorder %v2116_v62, %v2115_v50  ;;  %vm2132_vm4 = vcmp.lt.s32.totalorder %v1633_v40, %v1511_v15 }
  0xe4   :  { %v377_v54 = vsel %vm2130_vm14, %v2126_v24, 2147483647  ;;  %v388_v60 = vsel %vm2131_vm5, %v2116_v62, %v2115_v50  ;;  %v244_v43 = vsel %vm2132_vm4, %v1633_v40, %v1511_v15  ;;  %vm2133_vm7 = vcmp.lt.s32.totalorder %v1636_v55, %v1515_v17 }
  0xe5   :  { %v326_v12 = vsel %vm2133_vm7, %v1636_v55, %v1515_v17  ;;  %vm395_vm8 = vcmp.lt.s32.totalorder %v388_v60, %v377_v54  ;;  %vm2134_vm3 = vcmp.eq.s32.totalorder %v1452_v39, %v895_v34  ;;  %v232_v23 = vsel %vm231_vm9, %v224_v42, %v213_v3 }
  0xe6   :  { %v459_v16 = vsel %vm2134_vm3, %v2126_v24, 2147483647  ;;  %v314_v50 = vsel %vm313_vm2, %v306_v59, %v295_v63  ;;  %vm2135_vm0 = vcmp.lt.s32.totalorder %v2119_v5, %v2118_v61  ;;  %vm2136_vm1 = vcmp.eq.s32.totalorder %v1452_v39, %v897_v35 }
  0xe7   :  { %v470_v15 = vsel %vm2135_vm0, %v2119_v5, %v2118_v61  ;;  %v541_v40 = vsel %vm2136_vm1, %v2126_v24, 2147483647  ;;  %vm2137_vm12 = vcmp.lt.s32.totalorder %v1638_v4, %v1517_v26  ;;  %vm2138_vm9 = vcmp.lt.s32.totalorder %v2121_v38, %v2120_v53  ;;  %v1895_v61 = vpop.permute.xlu0 %76 }
  0xe8   :  { %v408_v17 = vsel %vm2137_vm12, %v1638_v4, %v1517_v26  ;;  %vm477_vm10 = vcmp.lt.s32.totalorder %v470_v15, %v459_v16  ;;  %v552_v55 = vsel %vm2138_vm9, %v2121_v38, %v2120_v53  ;;  %vm2139_vm15 = vcmp.eq.s32.totalorder %v1452_v39, %v899_v36 }
  0xe9   :  { %v623_v62 = vsel %vm2139_vm15, %v2126_v24, 2147483647  ;;  %v396_v5 = vsel %vm395_vm8, %v388_v60, %v377_v54  ;;  %vm2140_vm2 = vcmp.lt.s32.totalorder %v1640_v52, %v1532_v19  ;;  %vm559_vm14 = vcmp.lt.s32.totalorder %v552_v55, %v541_v40 }
  0xea   :  { %v1902_v26 = vsel %vm2140_vm2, %v1640_v52, %v1532_v19  ;;  %vm2141_vm5 = vcmp.lt.s32.totalorder %v2123_v44, %v2122_v13  ;;  %v478_v14 = vsel %vm477_vm10, %v470_v15, %v459_v16  ;;  %v1914_v41 = vsel %vm571_vm11, %v1669_v8, %v1535_v28  ;;  %v2143_v8 = vld [vmem:[#allocation11_spill] sm:$0xff] }
  0xeb   :  { %v634_v4 = vsel %vm2141_vm5, %v2123_v44, %v2122_v13  ;;  %vm2142_vm7 = vcmp.lt.s32.totalorder %v1671_v56, %v1557_v22  ;;  %v1923_v52 = vsel %vm559_vm14, %v552_v55, %v541_v40  ;;  %v1929_v29 = vsel %vm689_vm13, %v2126_v24, 2147483647  ;;  %v261_v55 = vld [vmem:[#allocation2 + $0x1] sm:$0x1] }
  0xec   :  { %vm641_vm4 = vcmp.lt.s32.totalorder %v634_v4, %v623_v62  ;;  %v1921_v19 = vsel %vm2142_vm7, %v1671_v56, %v1557_v22  ;;  %v1936_v28 = vsel %vm715_vm6, %v2125_v18, %v2124_v21  ;;  %vm118_vm11 = vcmp.eq.s32.totalorder %v1895_v61, %v887_v30 }
  0xed   :  { %v1940_v22 = vsel %vm641_vm4, %v634_v4, %v623_v62  ;;  %v134_v56 = vsel %vm118_vm11, %v2143_v8, 2147483647  ;;  %vm201_vm8 = vcmp.eq.s32.totalorder %v1895_v61, %v889_v31  ;;  %vm283_vm13 = vcmp.eq.s32.totalorder %v1895_v61, %v891_v32 }
  0xee   :  { %vm156_vm3 = vcmp.lt.s32.totalorder %v149_v49, %v134_v56  ;;  %v217_v39 = vsel %vm201_vm8, %v2143_v8, 2147483647  ;;  %v299_v48 = vsel %vm283_vm13, %v2143_v8, 2147483647  ;;  %vm365_vm6 = vcmp.eq.s32.totalorder %v1895_v61, %v893_v33 }
  0xef   :  { %v157_v53 = vsel %vm156_vm3, %v149_v49, %v134_v56  ;;  %vm239_vm0 = vcmp.lt.s32.totalorder %v232_v23, %v217_v39  ;;  %vm321_vm1 = vcmp.lt.s32.totalorder %v314_v50, %v299_v48  ;;  %v381_v30 = vsel %vm365_vm6, %v2143_v8, 2147483647  ;;  %v425_v56 = vld [vmem:[#allocation2 + $0x3] sm:$0x1] }
  0xf0   :  { %vm162_vm12 = vcmp.lt.s32.totalorder %v157_v53, %v1780_v51  ;;  %v240_v38 = vsel %vm239_vm0, %v232_v23, %v217_v39  ;;  %v322_v31 = vsel %vm321_vm1, %v314_v50, %v299_v48  ;;  %vm403_vm10 = vcmp.lt.s32.totalorder %v396_v5, %v381_v30 }
  0xf1   :  { %v163_v32 = vsel %vm162_vm12, %v157_v53, %v1780_v51  ;;  %vm245_vm9 = vcmp.lt.s32.totalorder %v240_v38, %v1797_v6  ;;  %vm327_vm15 = vcmp.lt.s32.totalorder %v322_v31, %v1802_v58  ;;  %v404_v13 = vsel %vm403_vm10, %v396_v5, %v381_v30 }
  0xf2   :  { %vm164_vm2 = vcmp.lt.s32.totalorder %v161_v27, %v163_v32  ;;  %v246_v33 = vsel %vm245_vm9, %v240_v38, %v1797_v6  ;;  %v328_v44 = vsel %vm327_vm15, %v322_v31, %v1802_v58  ;;  %vm409_vm14 = vcmp.lt.s32.totalorder %v404_v13, %v1816_v20 }
  0xf3   :  { %v165_v57 = vsel %vm164_vm2, %v161_v27, %v163_v32  ;;  %vm247_vm5 = vcmp.lt.s32.totalorder %v244_v43, %v246_v33  ;;  %vm329_vm4 = vcmp.lt.s32.totalorder %v326_v12, %v328_v44  ;;  %v410_v10 = vsel %vm409_vm14, %v404_v13, %v1816_v20 }
  0xf4   :  { %v166_v21 = vrot.slane %v165_v57, 4  ;;  %v248_v18 = vsel %vm247_vm5, %v244_v43, %v246_v33  ;;  %v330_v51 = vsel %vm329_vm4, %v326_v12, %v328_v44  ;;  %vm411_vm7 = vcmp.lt.s32.totalorder %v408_v17, %v410_v10 }
  0xf5   :  { %v249_v11 = vrot.slane %v248_v18, 4  ;;  %v331_v7 = vrot.slane %v330_v51, 4  ;;  %v412_v24 = vsel %vm411_vm7, %v408_v17, %v410_v10  ;;  %vm447_vm11 = vcmp.eq.s32.totalorder %v1895_v61, %v895_v34 }
  0xf6   :  { %vm167_vm8 = vcmp.lt.s32.totalorder %v165_v57, %v166_v21  ;;  %v413_v6 = vrot.slane %v412_v24, 4  ;;  %v463_v58 = vsel %vm447_vm11, %v2143_v8, 2147483647  ;;  %vm529_vm13 = vcmp.eq.s32.totalorder %v1895_v61, %v897_v35 }
  0xf7   :  { %v168_v45 = vsel %vm167_vm8, %v165_v57, %v166_v21  ;;  %vm250_vm3 = vcmp.lt.s32.totalorder %v248_v18, %v249_v11  ;;  %vm332_vm6 = vcmp.lt.s32.totalorder %v330_v51, %v331_v7  ;;  %vm485_vm0 = vcmp.lt.s32.totalorder %v478_v14, %v463_v58 }
  0xf8   :  { %v169_v47 = vrot.slane %v168_v45, 2  ;;  %v251_v20 = vsel %vm250_vm3, %v248_v18, %v249_v11  ;;  %v333_v3 = vsel %vm332_vm6, %v330_v51, %v331_v7  ;;  %vm414_vm1 = vcmp.lt.s32.totalorder %v412_v24, %v413_v6  ;;  %v507_v7 = vld [vmem:[#allocation2 + $0x4] sm:$0x1] }
  0xf9   :  { %v252_v42 = vrot.slane %v251_v20, 2  ;;  %v334_v27 = vrot.slane %v333_v3, 2  ;;  %v415_v63 = vsel %vm414_vm1, %v412_v24, %v413_v6  ;;  %v486_v59 = vsel %vm485_vm0, %v478_v14, %v463_v58  ;;  %v343_v14 = vld [vmem:[#allocation2 + $0x2] sm:$0x1] }
  0xfa   :  { %vm170_vm12 = vcmp.lt.s32.totalorder %v168_v45, %v169_v47  ;;  %v416_v34 = vrot.slane %v415_v63, 2  ;;  %vm491_vm10 = vcmp.lt.s32.totalorder %v486_v59, %v1818_v1  ;;  %v545_v49 = vsel %vm529_vm13, %v2143_v8, 2147483647 }
  0xfb   :  { %v171_v54 = vsel %vm170_vm12, %v168_v45, %v169_v47  ;;  %vm253_vm9 = vcmp.lt.s32.totalorder %v251_v20, %v252_v42  ;;  %vm335_vm15 = vcmp.lt.s32.totalorder %v333_v3, %v334_v27  ;;  %v492_v60 = vsel %vm491_vm10, %v486_v59, %v1818_v1  ;;  %v179_v1 = vld [vmem:[#allocation2] sm:$0x1]  ;;  %v589_v59 = vld [vmem:[#allocation2 + $0x5] sm:$0x1] }
  0xfc   :  { %vm723_vm2 = vcmp.lt.s32.totalorder %v1936_v28, %v1929_v29  ;;  %v172_v43 = vrot.slane %v171_v54, 1  ;;  %v254_v12 = vsel %vm253_vm9, %v251_v20, %v252_v42  ;;  %v336_v16 = vsel %vm335_vm15, %v333_v3, %v334_v27 }
  0xfd   :  { %vm417_vm14 = vcmp.lt.s32.totalorder %v415_v63, %v416_v34  ;;  %v255_v23 = vrot.slane %v254_v12, 1  ;;  %v337_v50 = vrot.slane %v336_v16, 1  ;;  %vm493_vm5 = vcmp.lt.s32.totalorder %v1902_v26, %v492_v60 }
  0xfe   :  { %v418_v15 = vsel %vm417_vm14, %v415_v63, %v416_v34  ;;  %vm173_vm4 = vcmp.lt.s32.totalorder %v171_v54, %v172_v43  ;;  %v494_v40 = vsel %vm493_vm5, %v1902_v26, %v492_v60  ;;  %vm567_vm7 = vcmp.lt.s32.totalorder %v1923_v52, %v545_v49 }
  0xff   :  { %v419_v35 = vrot.slane %v418_v15, 1  ;;  %v174_v17 = vsel %vm173_vm4, %v171_v54, %v172_v43  ;;  %vm256_vm11 = vcmp.lt.s32.totalorder %v254_v12, %v255_v23  ;;  %vm338_vm8 = vcmp.lt.s32.totalorder %v336_v16, %v337_v50 }
 0x100   :  { %v495_v62 = vrot.slane %v494_v40, 4  ;;  %vm735_vm13 = vcmp.lt.s32.totalorder %v1677_v9, %v1597_v25  ;;  %vm175_vm3 = vcmp.lt.s32.totalorder %v174_v17, 2147483647  ;;  %v257_v5 = vsel %vm256_vm11, %v254_v12, %v255_v23  ;;  %v671_v12 = vld [vmem:[#allocation2 + $0x6] sm:$0x1] }
 0x101   :  { %v339_v4 = vsel %vm338_vm8, %v336_v16, %v337_v50  ;;  %vm420_vm6 = vcmp.lt.s32.totalorder %v418_v15, %v419_v35  ;;  %v178_v39 = vsel %vm175_vm3, %v174_v17, 2147483647  ;;  %vm258_vm0 = vcmp.lt.s32.totalorder %v257_v5, 2147483647  ;;  %v753_v50 = vld [vmem:[#allocation2 + $0x7] sm:$0x1] }
 0x102   :  { %vm340_vm1 = vcmp.lt.s32.totalorder %v339_v4, 2147483647  ;;  %v421_v26 = vsel %vm420_vm6, %v418_v15, %v419_v35  ;;  %vm180_vm12 = vcmp.lt.s32.totalorder %v179_v1, %v178_v39  ;;  %v260_v48 = vsel %vm258_vm0, %v257_v5, 2147483647 }
 0x103   :  { %v342_v53 = vsel %vm340_vm1, %v339_v4, 2147483647  ;;  %vm422_vm10 = vcmp.lt.s32.totalorder %v421_v26, 2147483647  ;;  %v181_v30 = vsel %vm180_vm12, %v179_v1, %v178_v39  ;;  %vm262_vm9 = vcmp.lt.s32.totalorder %v261_v55, %v260_v48 }
 0x104   :  { %vm344_vm15 = vcmp.lt.s32.totalorder %v343_v14, %v342_v53  ;;  %v424_v38 = vsel %vm422_vm10, %v421_v26, 2147483647  ;;  %v263_v31 = vsel %vm262_vm9, %v261_v55, %v260_v48  ;;  %vm496_vm5 = vcmp.lt.s32.totalorder %v494_v40, %v495_v62  ;;  %182 = vst [vmem:[#allocation2] sm:$0x1] %v181_v30 }
 0x105   :  { %v345_v32 = vsel %vm344_vm15, %v343_v14, %v342_v53  ;;  %vm426_vm14 = vcmp.lt.s32.totalorder %v425_v56, %v424_v38  ;;  %v497_v33 = vsel %vm496_vm5, %v494_v40, %v495_v62  ;;  %v568_v44 = vsel %vm567_vm7, %v1923_v52, %v545_v49  ;;  %264 = vst [vmem:[#allocation2 + $0x1] sm:$0x1] %v263_v31 }
 0x106   :  { %v427_v13 = vsel %vm426_vm14, %v425_v56, %v424_v38  ;;  %vm611_vm4 = vcmp.eq.s32.totalorder %v1895_v61, %v899_v36  ;;  %346 = vst [vmem:[#allocation2 + $0x2] sm:$0x1] %v345_v32  ;;  %v498_v57 = vrot.slane %v497_v33, 2  ;;  %vm573_vm11 = vcmp.lt.s32.totalorder %v568_v44, %v1820_v46 }
 0x107   :  { %v627_v10 = vsel %vm611_vm4, %v2143_v8, 2147483647  ;;  %vm693_vm8 = vcmp.eq.s32.totalorder %v1895_v61, %v901_v37  ;;  %428 = vst [vmem:[#allocation2 + $0x3] sm:$0x1] %v427_v13  ;;  %v724_v52 = vsel %vm723_vm2, %v1936_v28, %v1929_v29  ;;  %v574_v21 = vsel %vm573_vm11, %v568_v44, %v1820_v46 }
 0x108   :  { %vm649_vm7 = vcmp.lt.s32.totalorder %v1940_v22, %v627_v10  ;;  %v709_v36 = vsel %vm693_vm8, %v2143_v8, 2147483647  ;;  %vm499_vm3 = vcmp.lt.s32.totalorder %v497_v33, %v498_v57  ;;  %vm575_vm6 = vcmp.lt.s32.totalorder %v1914_v41, %v574_v21 }
 0x109   :  { %v650_v18 = vsel %vm649_vm7, %v1940_v22, %v627_v10  ;;  %vm731_vm0 = vcmp.lt.s32.totalorder %v724_v52, %v709_v36  ;;  %v500_v37 = vsel %vm499_vm3, %v497_v33, %v498_v57  ;;  %v576_v61 = vsel %vm575_vm6, %v1914_v41, %v574_v21 }
 0x10a   :  { %vm655_vm1 = vcmp.lt.s32.totalorder %v650_v18, %v1822_v2  ;;  %v732_v51 = vsel %vm731_vm0, %v724_v52, %v709_v36  ;;  %v501_v11 = vrot.slane %v500_v37, 1  ;;  %v577_v29 = vrot.slane %v576_v61, 4 }
 0x10b   :  { %v656_v46 = vsel %vm655_vm1, %v650_v18, %v1822_v2  ;;  %vm737_vm2 = vcmp.lt.s32.totalorder %v732_v51, %v1824_v0  ;;  %v736_v28 = vsel %vm735_vm13, %v1677_v9, %v1597_v25 }
 0x10c   :  { %vm657_vm12 = vcmp.lt.s32.totalorder %v1921_v19, %v656_v46  ;;  %v738_v22 = vsel %vm737_vm2, %v732_v51, %v1824_v0  ;;  %vm502_vm10 = vcmp.lt.s32.totalorder %v500_v37, %v501_v11  ;;  %vm578_vm9 = vcmp.lt.s32.totalorder %v576_v61, %v577_v29 }
 0x10d   :  { %v658_v41 = vsel %vm657_vm12, %v1921_v19, %v656_v46  ;;  %vm739_vm15 = vcmp.lt.s32.totalorder %v736_v28, %v738_v22  ;;  %v503_v8 = vsel %vm502_vm10, %v500_v37, %v501_v11  ;;  %v579_v2 = vsel %vm578_vm9, %v576_v61, %v577_v29 }
 0x10e   :  { %v659_v24 = vrot.slane %v658_v41, 4  ;;  %v740_v6 = vsel %vm739_vm15, %v736_v28, %v738_v22  ;;  %vm504_vm14 = vcmp.lt.s32.totalorder %v503_v8, 2147483647  ;;  %v580_v58 = vrot.slane %v579_v2, 2 }
 0x10f   :  { %v741_v45 = vrot.slane %v740_v6, 4  ;;  %v506_v47 = vsel %vm504_vm14, %v503_v8, 2147483647 }
 0x110   :  { %vm660_vm5 = vcmp.lt.s32.totalorder %v658_v41, %v659_v24  ;;  %vm508_vm13 = vcmp.lt.s32.totalorder %v507_v7, %v506_v47  ;;  %vm581_vm4 = vcmp.lt.s32.totalorder %v579_v2, %v580_v58 }
 0x111   :  { %v661_v25 = vsel %vm660_vm5, %v658_v41, %v659_v24  ;;  %vm742_vm11 = vcmp.lt.s32.totalorder %v740_v6, %v741_v45  ;;  %v509_v9 = vsel %vm508_vm13, %v507_v7, %v506_v47  ;;  %v582_v0 = vsel %vm581_vm4, %v579_v2, %v580_v58 }
 0x112   :  { %v662_v20 = vrot.slane %v661_v25, 2  ;;  %v743_v3 = vsel %vm742_vm11, %v740_v6, %v741_v45  ;;  %v583_v19 = vrot.slane %v582_v0, 1  ;;  %510 = vst [vmem:[#allocation2 + $0x4] sm:$0x1] %v509_v9 }
 0x113   :  { %v744_v42 = vrot.slane %v743_v3, 2 }
 0x114   :  { %vm663_vm8 = vcmp.lt.s32.totalorder %v661_v25, %v662_v20  ;;  %vm584_vm7 = vcmp.lt.s32.totalorder %v582_v0, %v583_v19 }
 0x115   :  { %v664_v27 = vsel %vm663_vm8, %v661_v25, %v662_v20  ;;  %vm745_vm3 = vcmp.lt.s32.totalorder %v743_v3, %v744_v42  ;;  %v585_v63 = vsel %vm584_vm7, %v582_v0, %v583_v19 }
 0x116   :  { %v665_v34 = vrot.slane %v664_v27, 1  ;;  %v746_v49 = vsel %vm745_vm3, %v743_v3, %v744_v42  ;;  %vm586_vm6 = vcmp.lt.s32.totalorder %v585_v63, 2147483647 }
 0x117   :  { %v747_v54 = vrot.slane %v746_v49, 1  ;;  %v588_v60 = vsel %vm586_vm6, %v585_v63, 2147483647 }
 0x118   :  { %vm666_vm0 = vcmp.lt.s32.totalorder %v664_v27, %v665_v34  ;;  %vm590_vm1 = vcmp.lt.s32.totalorder %v589_v59, %v588_v60 }
 0x119   :  { %v667_v43 = vsel %vm666_vm0, %v664_v27, %v665_v34  ;;  %vm748_vm2 = vcmp.lt.s32.totalorder %v746_v49, %v747_v54  ;;  %v591_v16 = vsel %vm590_vm1, %v589_v59, %v588_v60 }
 0x11a   :  { %vm668_vm12 = vcmp.lt.s32.totalorder %v667_v43, 2147483647  ;;  %v749_v23 = vsel %vm748_vm2, %v746_v49, %v747_v54  ;;  %592 = vst [vmem:[#allocation2 + $0x5] sm:$0x1] %v591_v16 }
 0x11b   :  { %v670_v15 = vsel %vm668_vm12, %v667_v43, 2147483647  ;;  %vm750_vm10 = vcmp.lt.s32.totalorder %v749_v23, 2147483647 }
 0x11c   :  { %vm672_vm9 = vcmp.lt.s32.totalorder %v671_v12, %v670_v15  ;;  %v752_v35 = vsel %vm750_vm10, %v749_v23, 2147483647 }
 0x11d   :  { %v673_v40 = vsel %vm672_vm9, %v671_v12, %v670_v15  ;;  %vm754_vm15 = vcmp.lt.s32.totalorder %v753_v50, %v752_v35 }
 0x11e   :  { %v755_v17 = vsel %vm754_vm15, %v753_v50, %v752_v35  ;;  %674 = vst [vmem:[#allocation2 + $0x6] sm:$0x1] %v673_v40 }
 0x11f   :  { %756 = vst [vmem:[#allocation2 + $0x7] sm:$0x1] %v755_v17 }
 0x126   :  { %v760_v1 = vld [vmem:[#allocation2] sm:$0xff] }
 0x127   :  { %vm761_vm14 = vcmp.lt.s32.totalorder %v760_v1, 2147483647 }
 0x128   :  { %v762_v55 = vsel %vm761_vm14, %v760_v1, 1 }
 0x129   :  { %763 = vst [vmem:[#allocation3] sm:$0xff] %v762_v55 }
 0x12a   :  { %794 = shalt.err (!%p791_p4)
}
 0x12b   :  { %s795_s18 = scalar_lea.hbm %s2023_s2, 128 }
 0x12c   :  { %p796_p5 = scmp.ne.s32.totalorder %s2023_s2, %s795_s18  ;;  %p799_p6 = scmp.lt.u32.totalorder %s795_s18, %s2023_s2 }
 0x12e   :  { %p801_p7 = pnand %p799_p6, %p796_p5 }
 0x130   :  { %804 = shalt.err (!%p801_p7)
}
 0x131   :  { %773 = dma.vmem_to_hbm [thread:$0]  %s771_s1, 128, %s2023_s2, [#allocation4]  }
 0x132   :  { %805 = dma.done.wait [#allocation4], 128  }
 0x133   :  { %806 = vsyncadd [#allocation4], 4294967168 }
 0x134   :  { %777 = vsyncpa [#allocation4], 1 }

</bundles_post_ra>
